<compile_context>
chip_gen: v7x
topology: tpu7x:2x2x1
jax: 0.10.0
libtpu: 0.0.40
codegen_flags: <defaults>
</compile_context>

<pallas_src>
import math

import jax
import jax.numpy as jnp
from jax.experimental import pallas as pl
from jax.experimental.pallas import tpu as pltpu


def net3_kernel(a_ref, xk_ref, xi_ref, deg_ref,
                wl_ref, wr_ref, bl_ref,
                w1_ref, b1_ref, w2_ref, b2_ref,
                out_ref, acc_ref):
    """Grid = (row tiles i, reduction tiles k over source nodes)."""
    k = pl.program_id(1)

    @pl.when(k == 0)
    def _init():
        acc_ref[...] = jnp.zeros_like(acc_ref)

    # --- SAGEConv "mean" aggregation: s = A @ x ---------------------------
    # bf16 x bf16 -> f32 accumulate (full-rate MXU).  A entries are exact
    # small integer edge counts in bf16; only x carries bf16 rounding.
    acc_ref[...] += jnp.dot(a_ref[...], xk_ref[...],
                            preferred_element_type=jnp.float32)

    @pl.when(k == pl.num_programs(1) - 1)
    def _finalize():
        # mean = sum / deg  (deg pre-clipped to >= 1 in the wrapper)
        inv_deg = pl.reciprocal(deg_ref[...], approx=False)
        agg = acc_ref[...] * inv_deg                              # (tm, F_in) f32
        # SAGEConv: lin_l(agg) + lin_r(x_root) + bias  (all f32 from here on)
        h = (jnp.dot(agg, wl_ref[...], preferred_element_type=jnp.float32)
             + jnp.dot(xi_ref[...], wr_ref[...],
                       preferred_element_type=jnp.float32)
             + bl_ref[...])
        h = jnp.maximum(h, 0.0)                                   # ReLU
        # F.dropout(x, training=False) is the identity (inference semantics).
        # TODO(synk): training-mode dropout (random mask + 1/(1-p) scale) not emitted.
        h1 = jnp.maximum(jnp.dot(h, w1_ref[...],
                                 preferred_element_type=jnp.float32)
                         + b1_ref[...], 0.0)                      # fc1 + ReLU
        out_ref[...] = (jnp.dot(h1, w2_ref[...],
                                preferred_element_type=jnp.float32)
                        + b2_ref[...])                            # fc2


def net3_forward(x, edge_index, params, *, tile_m=None, tile_k=None):
    """x: (N, F_in) f32; edge_index: (2, E) int32 (row 0 = src, row 1 = dst)."""
    n, f_in = x.shape
    d1 = params["wl"].shape[1]
    d2 = params["w1"].shape[1]
    f_out = params["w2"].shape[1]

    # --- tiling selection --------------------------------------------------
    if tile_m is None and tile_k is None:
        tile_m = 128
        # even number of row tiles -> balanced "parallel" axis on v7x megacore
        n_pad = pl.cdiv(n, 2 * tile_m) * (2 * tile_m)
        if tile_m * n_pad * 2 <= 4 * 1024 * 1024:
            # whole bf16 A row strip fits comfortably in VMEM: collapse the
            # reduction grid to a single k step (no per-step overhead).
            tile_k = n_pad
        else:
            # large-N path: HBM-roofline tiles, still < ~5 MiB VMEM footprint
            tile_m, tile_k = 512, 2048
            n_pad = pl.cdiv(n, tile_k) * tile_k
    else:
        tile_m = tile_m or 128
        tile_k = tile_k or 2048
        step = math.lcm(tile_m, tile_k)
        n_pad = pl.cdiv(n, step) * step

    pn = n_pad - n
    f_pad = pl.cdiv(f_out, 128) * 128
    pf = f_pad - f_out

    # --- glue: edge list -> padded bf16 count adjacency + clipped degree ---
    # (scatter-add has no clean single-kernel Pallas equivalent; degree is an
    # O(E) scatter and the mean normalization happens inside the kernel.)
    src, dst = edge_index[0], edge_index[1]
    adj = jnp.zeros((n_pad, n_pad), jnp.bfloat16).at[dst, src].add(1.0)
    deg = jnp.clip(jnp.zeros((n,), jnp.float32).at[dst].add(1.0), 1.0, None)
    deg_p = jnp.pad(deg[:, None], ((0, pn), (0, 0)), constant_values=1.0)

    x_p = jnp.pad(x, ((0, pn), (0, 0)))
    x_bf = x_p.astype(jnp.bfloat16)          # aggregation operand (bf16 MXU)
    w2p = jnp.pad(params["w2"], ((0, 0), (0, pf)))
    b2p = jnp.pad(params["b2"], ((0, 0), (0, pf)))

    grid = (n_pad // tile_m, n_pad // tile_k)
    const = lambda i, k: (0, 0)

    out = pl.pallas_call(
        net3_kernel,
        out_shape=jax.ShapeDtypeStruct((n_pad, f_pad), jnp.float32),
        grid_spec=pltpu.PrefetchScalarGridSpec(
            num_scalar_prefetch=0,
            grid=grid,
            in_specs=[
                pl.BlockSpec((tile_m, tile_k), lambda i, k: (i, k)),  # A (bf16)
                pl.BlockSpec((tile_k, f_in), lambda i, k: (k, 0)),    # x src (bf16)
                pl.BlockSpec((tile_m, f_in), lambda i, k: (i, 0)),    # x root (f32)
                pl.BlockSpec((tile_m, 1), lambda i, k: (i, 0)),       # deg (f32)
                pl.BlockSpec((f_in, d1), const),                      # wl
                pl.BlockSpec((f_in, d1), const),                      # wr
                pl.BlockSpec((1, d1), const),                         # bl
                pl.BlockSpec((d1, d2), const),                        # w1
                pl.BlockSpec((1, d2), const),                         # b1
                pl.BlockSpec((d2, f_pad), const),                     # w2 (lane-padded)
                pl.BlockSpec((1, f_pad), const),                      # b2 (lane-padded)
            ],
            out_specs=pl.BlockSpec((tile_m, f_pad), lambda i, k: (i, 0)),
            scratch_shapes=[pltpu.VMEM((tile_m, f_in), jnp.float32)],
        ),
        compiler_params=pltpu.CompilerParams(
            dimension_semantics=("parallel", "arbitrary"),
        ),
    )(adj, x_bf, x_p, deg_p,
      params["wl"], params["wr"], params["bl"],
      params["w1"], params["b1"], w2p, b2p)

    return out[:n, :f_out]


def init_params(key, num_features=1, d1=128, d2=128):
    ks = jax.random.split(key, 7)
    scale = 0.1
    return {
        # SAGEConv: lin_l (aggregation path, has bias), lin_r (root path, no bias)
        "wl": scale * jax.random.normal(ks[0], (num_features, d1), jnp.float32),
        "bl": scale * jax.random.normal(ks[1], (1, d1), jnp.float32),
        "wr": scale * jax.random.normal(ks[2], (num_features, d1), jnp.float32),
        # fc1
        "w1": scale * jax.random.normal(ks[3], (d1, d2), jnp.float32),
        "b1": scale * jax.random.normal(ks[4], (1, d2), jnp.float32),
        # fc2
        "w2": scale * jax.random.normal(ks[5], (d2, num_features), jnp.float32),
        "b2": scale * jax.random.normal(ks[6], (1, num_features), jnp.float32),
    }


if __name__ == "__main__":
    key = jax.random.PRNGKey(0)
    k_x, k_p = jax.random.split(key)

    num_nodes = 600          # not a tile multiple -> exercises padding (n_pad=768)
    num_features = 1
    d1, d2 = 128, 128

    # Node features (N, F_in)
    x = jax.random.normal(k_x, (num_nodes, num_features), jnp.float32)

    # Deterministic circulant graph: edges i -> (i +/- o) for o in {1, 2, 5}
    idx = jnp.arange(num_nodes, dtype=jnp.int32)
    offsets = (1, 2, 5)
    src = jnp.concatenate([idx] * (2 * len(offsets)))
    dst = jnp.concatenate([(idx + o) % num_nodes for o in offsets]
                          + [(idx - o) % num_nodes for o in offsets])
    edge_index = jnp.stack([src, dst], axis=0)

    params = init_params(k_p, num_features=num_features, d1=d1, d2=d2)

    out = net3_forward(x, edge_index, params)
    jax.block_until_ready(out)

    # Pure-JAX f32 reference (same math, no Pallas)
    adj = jnp.zeros((num_nodes, num_nodes), jnp.float32).at[dst, src].add(1.0)
    deg = jnp.clip(adj.sum(axis=1, keepdims=True), 1.0, None)
    agg = (adj @ x) / deg
    h = jnp.maximum(agg @ params["wl"] + x @ params["wr"] + params["bl"], 0.0)
    h1 = jnp.maximum(h @ params["w1"] + params["b1"], 0.0)
    ref = h1 @ params["w2"] + params["b2"]

    assert out.shape == (num_nodes, num_features)
    max_err = float(jnp.max(jnp.abs(out - ref)))
    # Aggregation uses a bf16 x operand (~2^-9 relative rounding on one input,
    # f32 accumulation), so tolerance is looser than pure-f32.
    assert jnp.allclose(out, ref, atol=3e-3, rtol=2e-2), f"max_err={max_err}"

    print("KERNEL_OK")
</pallas_src>

<mosaic_0001>
module attributes {stable_mosaic.version = 11 : i64} {
  func.func @net3_kernel(%arg0: i32, %arg1: i32, %arg2: memref<128x768xbf16, #tpu.memory_space<vmem>>, %arg3: memref<768x1xbf16, #tpu.memory_space<vmem>>, %arg4: memref<128x1xf32, #tpu.memory_space<vmem>>, %arg5: memref<128x1xf32, #tpu.memory_space<vmem>>, %arg6: memref<1x128xf32, #tpu.memory_space<vmem>>, %arg7: memref<1x128xf32, #tpu.memory_space<vmem>>, %arg8: memref<1x128xf32, #tpu.memory_space<vmem>>, %arg9: memref<128x128xf32, #tpu.memory_space<vmem>>, %arg10: memref<1x128xf32, #tpu.memory_space<vmem>>, %arg11: memref<128x128xf32, #tpu.memory_space<vmem>>, %arg12: memref<1x128xf32, #tpu.memory_space<vmem>>, %arg13: memref<128x128xf32, #tpu.memory_space<vmem>>, %arg14: memref<128x1xf32, #tpu.memory_space<vmem>>) attributes {dimension_semantics = [#tpu.dimension_semantics<parallel>, #tpu.dimension_semantics<arbitrary>], iteration_bounds = array<i64: 6, 1>, scalar_prefetch = 0 : i64, scratch_operands = 1 : i64, tpu.core_type = #tpu.core_type<tc>, window_params = [{transform_indices = @transform_0, window_bounds = array<i64: 128, 768>}, {transform_indices = @transform_1, window_bounds = array<i64: 768, 1>}, {transform_indices = @transform_2, window_bounds = array<i64: 128, 1>}, {transform_indices = @transform_3, window_bounds = array<i64: 128, 1>}, {pipeline_mode = #tpu.pipeline_mode<synchronous>, transform_indices = @transform_4, window_bounds = array<i64: 1, 128>}, {pipeline_mode = #tpu.pipeline_mode<synchronous>, transform_indices = @transform_5, window_bounds = array<i64: 1, 128>}, {pipeline_mode = #tpu.pipeline_mode<synchronous>, transform_indices = @transform_6, window_bounds = array<i64: 1, 128>}, {pipeline_mode = #tpu.pipeline_mode<synchronous>, transform_indices = @transform_7, window_bounds = array<i64: 128, 128>}, {pipeline_mode = #tpu.pipeline_mode<synchronous>, transform_indices = @transform_8, window_bounds = array<i64: 1, 128>}, {pipeline_mode = #tpu.pipeline_mode<synchronous>, transform_indices = @transform_9, window_bounds = array<i64: 128, 128>}, {pipeline_mode = #tpu.pipeline_mode<synchronous>, transform_indices = @transform_10, window_bounds = array<i64: 1, 128>}, {transform_indices = @transform_11, window_bounds = array<i64: 128, 128>}]} {
    %c0_i32 = arith.constant 0 : i32
    %0 = arith.cmpi eq, %arg1, %c0_i32 : i32
    %1 = arith.extui %0 : i1 to i32
    %c0_i32_0 = arith.constant 0 : i32
    %2 = arith.cmpi ne, %1, %c0_i32_0 : i32
    scf.if %2 {
      %cst_10 = arith.constant 0.000000e+00 : f32
      %12 = vector.broadcast %cst_10 : f32 to vector<128x1xf32>
      %c0_11 = arith.constant 0 : index
      %c0_12 = arith.constant 0 : index
      %13 = vector.load %arg14[%c0_11, %c0_12] : memref<128x1xf32, #tpu.memory_space<vmem>>, vector<128x1xf32>
      tpu.vector_store %arg14[%c0_11, %c0_12], %12 {strides = array<i32>} : memref<128x1xf32, #tpu.memory_space<vmem>>, vector<128x1xf32>,
    } else {
    }
    %c0 = arith.constant 0 : index
    %c0_1 = arith.constant 0 : index
    %3 = vector.load %arg14[%c0, %c0_1] : memref<128x1xf32, #tpu.memory_space<vmem>>, vector<128x1xf32>
    %c0_2 = arith.constant 0 : index
    %c0_3 = arith.constant 0 : index
    %4 = vector.load %arg2[%c0_2, %c0_3] : memref<128x768xbf16, #tpu.memory_space<vmem>>, vector<128x768xbf16>
    %c0_4 = arith.constant 0 : index
    %c0_5 = arith.constant 0 : index
    %5 = vector.load %arg3[%c0_4, %c0_5] : memref<768x1xbf16, #tpu.memory_space<vmem>>, vector<768x1xbf16>
    %cst = arith.constant dense<0.000000e+00> : vector<128x1xf32>
    %6 = tpu.matmul %4, %5, %cst {dimension_numbers = #tpu.dot_dimension_numbers<[1], [0], [0], [1], [0, 0, 1, 1], [], []>} : vector<128x768xbf16>, vector<768x1xbf16>, vector<128x1xf32> -> vector<128x1xf32>
    %7 = arith.addf %3, %6 : vector<128x1xf32>
    %c0_6 = arith.constant 0 : index
    %c0_7 = arith.constant 0 : index
    %8 = vector.load %arg14[%c0_6, %c0_7] : memref<128x1xf32, #tpu.memory_space<vmem>>, vector<128x1xf32>
    tpu.vector_store %arg14[%c0_6, %c0_7], %7 {strides = array<i32>} : memref<128x1xf32, #tpu.memory_space<vmem>>, vector<128x1xf32>,
    %c0_i32_8 = arith.constant 0 : i32
    %9 = arith.cmpi eq, %arg1, %c0_i32_8 : i32
    %10 = arith.extui %9 : i1 to i32
    %c0_i32_9 = arith.constant 0 : i32
    %11 = arith.cmpi ne, %10, %c0_i32_9 : i32
    scf.if %11 {
      %c0_10 = arith.constant 0 : index
      %c0_11 = arith.constant 0 : index
      %12 = vector.load %arg5[%c0_10, %c0_11] : memref<128x1xf32, #tpu.memory_space<vmem>>, vector<128x1xf32>
      %13 = tpu.reciprocal %12 : vector<128x1xf32> -> vector<128x1xf32>
      %c0_12 = arith.constant 0 : index
      %c0_13 = arith.constant 0 : index
      %14 = vector.load %arg14[%c0_12, %c0_13] : memref<128x1xf32, #tpu.memory_space<vmem>>, vector<128x1xf32>
      %15 = arith.mulf %14, %13 : vector<128x1xf32>
      %c0_14 = arith.constant 0 : index
      %c0_15 = arith.constant 0 : index
      %16 = vector.load %arg6[%c0_14, %c0_15] : memref<1x128xf32, #tpu.memory_space<vmem>>, vector<1x128xf32>
      %cst_16 = arith.constant dense<0.000000e+00> : vector<128x128xf32>
      %17 = tpu.matmul %15, %16, %cst_16 {dimension_numbers = #tpu.dot_dimension_numbers<[1], [0], [0], [1], [0, 0, 1, 1], [], []>} : vector<128x1xf32>, vector<1x128xf32>, vector<128x128xf32> -> vector<128x128xf32>
      %c0_17 = arith.constant 0 : index
      %c0_18 = arith.constant 0 : index
      %18 = vector.load %arg4[%c0_17, %c0_18] : memref<128x1xf32, #tpu.memory_space<vmem>>, vector<128x1xf32>
      %c0_19 = arith.constant 0 : index
      %c0_20 = arith.constant 0 : index
      %19 = vector.load %arg7[%c0_19, %c0_20] : memref<1x128xf32, #tpu.memory_space<vmem>>, vector<1x128xf32>
      %cst_21 = arith.constant dense<0.000000e+00> : vector<128x128xf32>
      %20 = tpu.matmul %18, %19, %cst_21 {dimension_numbers = #tpu.dot_dimension_numbers<[1], [0], [0], [1], [0, 0, 1, 1], [], []>} : vector<128x1xf32>, vector<1x128xf32>, vector<128x128xf32> -> vector<128x128xf32>
      %21 = arith.addf %17, %20 : vector<128x128xf32>
      %c0_22 = arith.constant 0 : index
      %c0_23 = arith.constant 0 : index
      %22 = vector.load %arg8[%c0_22, %c0_23] : memref<1x128xf32, #tpu.memory_space<vmem>>, vector<1x128xf32>
      %23 = vector.broadcast %22 : vector<1x128xf32> to vector<128x128xf32>
      %24 = arith.addf %21, %23 : vector<128x128xf32>
      %cst_24 = arith.constant 0.000000e+00 : f32
      %25 = vector.broadcast %cst_24 : f32 to vector<128x128xf32>
      %26 = arith.maximumf %24, %25 : vector<128x128xf32>
      %c0_25 = arith.constant 0 : index
      %c0_26 = arith.constant 0 : index
      %27 = vector.load %arg9[%c0_25, %c0_26] : memref<128x128xf32, #tpu.memory_space<vmem>>, vector<128x128xf32>
      %cst_27 = arith.constant dense<0.000000e+00> : vector<128x128xf32>
      %28 = tpu.matmul %26, %27, %cst_27 {dimension_numbers = #tpu.dot_dimension_numbers<[1], [0], [0], [1], [0, 0, 1, 1], [], []>} : vector<128x128xf32>, vector<128x128xf32>, vector<128x128xf32> -> vector<128x128xf32>
      %c0_28 = arith.constant 0 : index
      %c0_29 = arith.constant 0 : index
      %29 = vector.load %arg10[%c0_28, %c0_29] : memref<1x128xf32, #tpu.memory_space<vmem>>, vector<1x128xf32>
      %30 = vector.broadcast %29 : vector<1x128xf32> to vector<128x128xf32>
      %31 = arith.addf %28, %30 : vector<128x128xf32>
      %cst_30 = arith.constant 0.000000e+00 : f32
      %32 = vector.broadcast %cst_30 : f32 to vector<128x128xf32>
      %33 = arith.maximumf %31, %32 : vector<128x128xf32>
      %c0_31 = arith.constant 0 : index
      %c0_32 = arith.constant 0 : index
      %34 = vector.load %arg11[%c0_31, %c0_32] : memref<128x128xf32, #tpu.memory_space<vmem>>, vector<128x128xf32>
      %cst_33 = arith.constant dense<0.000000e+00> : vector<128x128xf32>
      %35 = tpu.matmul %33, %34, %cst_33 {dimension_numbers = #tpu.dot_dimension_numbers<[1], [0], [0], [1], [0, 0, 1, 1], [], []>} : vector<128x128xf32>, vector<128x128xf32>, vector<128x128xf32> -> vector<128x128xf32>
      %c0_34 = arith.constant 0 : index
      %c0_35 = arith.constant 0 : index
      %36 = vector.load %arg12[%c0_34, %c0_35] : memref<1x128xf32, #tpu.memory_space<vmem>>, vector<1x128xf32>
      %37 = vector.broadcast %36 : vector<1x128xf32> to vector<128x128xf32>
      %38 = arith.addf %35, %37 : vector<128x128xf32>
      %c0_36 = arith.constant 0 : index
      %c0_37 = arith.constant 0 : index
      %39 = vector.load %arg13[%c0_36, %c0_37] : memref<128x128xf32, #tpu.memory_space<vmem>>, vector<128x128xf32>
      tpu.vector_store %arg13[%c0_36, %c0_37], %38 {strides = array<i32>} : memref<128x128xf32, #tpu.memory_space<vmem>>, vector<128x128xf32>,
    } else {
    }
    return
  }
  func.func @transform_0(%arg0: i32, %arg1: i32) -> (i32, i32) {
    %c0_i32 = arith.constant 0 : i32
    return %arg0, %arg1 : i32, i32
  }
  func.func @transform_1(%arg0: i32, %arg1: i32) -> (i32, i32) {
    %c0_i32 = arith.constant 0 : i32
    %c0_i32_0 = arith.constant 0 : i32
    return %arg1, %c0_i32 : i32, i32
  }
  func.func @transform_2(%arg0: i32, %arg1: i32) -> (i32, i32) {
    %c0_i32 = arith.constant 0 : i32
    %c0_i32_0 = arith.constant 0 : i32
    return %arg0, %c0_i32 : i32, i32
  }
  func.func @transform_3(%arg0: i32, %arg1: i32) -> (i32, i32) {
    %c0_i32 = arith.constant 0 : i32
    %c0_i32_0 = arith.constant 0 : i32
    return %arg0, %c0_i32 : i32, i32
  }
  func.func @transform_4(%arg0: i32, %arg1: i32) -> (i32, i32) {
    %c0_i32 = arith.constant 0 : i32
    %c0_i32_0 = arith.constant 0 : i32
    %c0_i32_1 = arith.constant 0 : i32
    return %c0_i32, %c0_i32_0 : i32, i32
  }
  func.func @transform_5(%arg0: i32, %arg1: i32) -> (i32, i32) {
    %c0_i32 = arith.constant 0 : i32
    %c0_i32_0 = arith.constant 0 : i32
    %c0_i32_1 = arith.constant 0 : i32
    return %c0_i32, %c0_i32_0 : i32, i32
  }
  func.func @transform_6(%arg0: i32, %arg1: i32) -> (i32, i32) {
    %c0_i32 = arith.constant 0 : i32
    %c0_i32_0 = arith.constant 0 : i32
    %c0_i32_1 = arith.constant 0 : i32
    return %c0_i32, %c0_i32_0 : i32, i32
  }
  func.func @transform_7(%arg0: i32, %arg1: i32) -> (i32, i32) {
    %c0_i32 = arith.constant 0 : i32
    %c0_i32_0 = arith.constant 0 : i32
    %c0_i32_1 = arith.constant 0 : i32
    return %c0_i32, %c0_i32_0 : i32, i32
  }
  func.func @transform_8(%arg0: i32, %arg1: i32) -> (i32, i32) {
    %c0_i32 = arith.constant 0 : i32
    %c0_i32_0 = arith.constant 0 : i32
    %c0_i32_1 = arith.constant 0 : i32
    return %c0_i32, %c0_i32_0 : i32, i32
  }
  func.func @transform_9(%arg0: i32, %arg1: i32) -> (i32, i32) {
    %c0_i32 = arith.constant 0 : i32
    %c0_i32_0 = arith.constant 0 : i32
    %c0_i32_1 = arith.constant 0 : i32
    return %c0_i32, %c0_i32_0 : i32, i32
  }
  func.func @transform_10(%arg0: i32, %arg1: i32) -> (i32, i32) {
    %c0_i32 = arith.constant 0 : i32
    %c0_i32_0 = arith.constant 0 : i32
    %c0_i32_1 = arith.constant 0 : i32
    return %c0_i32, %c0_i32_0 : i32, i32
  }
  func.func @transform_11(%arg0: i32, %arg1: i32) -> (i32, i32) {
    %c0_i32 = arith.constant 0 : i32
    %c0_i32_0 = arith.constant 0 : i32
    return %arg0, %c0_i32 : i32, i32
  }
}

</mosaic_0001>

<bundles_post_ra>
// kernel: tpu_custom_call.1
= control target key start
LH: loop header
LB: loop body
LE: loop exit
PB: predicated region body
PF: predicated region fallthrough
CT: control target
= control target key end

     0   :  { %s4843_s0 = inlined_call_operand.hbm [shape: bf16[768,768], index: 0, kind: input, shape index: {}]   ;;  %s4844_s1 = inlined_call_operand.vmem [shape: bf16[768,1], index: 1, kind: input, shape index: {}]   ;;  %s4845_s2 = inlined_call_operand.vmem [shape: f32[768,1], index: 2, kind: input, shape index: {}]   ;;  %s4846_s3 = inlined_call_operand.vmem [shape: f32[768,1], index: 3, kind: input, shape index: {}]   ;;  %s4847_s4 = inlined_call_operand.hbm [shape: f32[1,128], index: 4, kind: input, shape index: {}]   ;;  %s4848_s5 = inlined_call_operand.hbm [shape: f32[1,128], index: 5, kind: input, shape index: {}]   ;;  %s4849_s6 = inlined_call_operand.hbm [shape: f32[1,128], index: 6, kind: input, shape index: {}]   ;;  %s4850_s7 = inlined_call_operand.hbm [shape: f32[128,128], index: 7, kind: input, shape index: {}]   ;;  %s4851_s8 = inlined_call_operand.hbm [shape: f32[1,128], index: 8, kind: input, shape index: {}]   ;;  %s4852_s9 = inlined_call_operand.hbm [shape: f32[128,128], index: 9, kind: input, shape index: {}]   ;;  %s4853_s10 = inlined_call_operand.hbm [shape: f32[1,128], index: 10, kind: input, shape index: {}]   ;;  %s4854_s11 = inlined_call_operand.hbm [shape: f32[768,128], index: 11, kind: output, shape index: {}]  }
   0x1   :  { %4861 = sst [smem:[#allocation24_spill]] %s4845_s2 }
   0x2   :  { %4862 = sst [smem:[#allocation25_spill]] %s4846_s3 }
   0x3   :  { %4863 = sst [smem:[#allocation26_spill]] %s4847_s4 }
   0x4   :  { %4864 = sst [smem:[#allocation27_spill]] %s4848_s5 }
   0x5   :  { %4865 = sst [smem:[#allocation28_spill]] %s4849_s6 }
   0x6   :  { %4866 = sst [smem:[#allocation29_spill]] %s4851_s8 }
   0x7   :  { %4867 = sst [smem:[#allocation30_spill]] %s4854_s11 }
   0x8   :  { %16 = vsyncpa [#allocation4], 0 }
   0x9   :  { %18 = vsyncpa [#allocation4 + $0x1], 0 }
   0xa   :  { %19 = vsyncpa [#allocation7], 0 }
   0xb   :  { %20 = vsyncpa [#allocation10], 0 }
   0xc   :  { %21 = vsyncpa [#allocation13], 0 }
   0xd   :  { %22 = vsyncpa [#allocation16], 0 }
   0xe   :  { %23 = vsyncpa [#allocation5], 0 }
   0xf   :  { %25 = vsyncpa [#allocation5 + $0x1], 0  ;;  %s4104_s17 = smov 0   ;;  %s4106_s18 = smov 0  }
  0x10   :  { %s4108_s19 = smov 0   ;;  %s4110_s20 = smov 0  }
  0x11   :  { %s4112_s21 = smov 0   ;;  %s4114_s22 = smov 0  }
  0x12 LB: > { %s4855_s23 = sadd.s32 4294967295, %s4026_s22   ;;  %p2708_p0 = scmp.ge.s32.totalorder %s4026_s22, 1  ;;  %s4026_s22 = sphi %s4114_s22, %s31_s22   ;;  %s4022_s21 = sphi %s4112_s21, %s4894_s21   ;;  %s4018_s20 = sphi %s4110_s20, %s4893_s20   ;;  %s4014_s19 = sphi %s4108_s19, %s4892_s19   ;;  %s4010_s18 = sphi %s4106_s18, %s4891_s18   ;;  %s4006_s17 = sphi %s4104_s17, %s4890_s17  }
  0x13   : > { %p4138_p1 = scmp.eq.s32.totalorder %s4855_s23, 0  ;;  %p327_p2 = scmp.lt.s32.totalorder %s4026_s22, 7 }
  0x14   : > { %s4028_s26 = smov [#allocation6]   ;;  %s4029_s28 = smov [#allocation9]  }
  0x15   : > { %s4868_s24 = scalar_select %p4138_p1, 1, 0 }
  0x16   : > { %p4143_p3 = pnand %p2708_p0, %p327_p2  ;;  %s349_s27 = sshll.u32 %s4028_s26, 4  ;;  %s350_s27 = int_to_ptr.vmem [resolvable:$true] %s349_s27 }
  0x17   : > { %s371_s29 = sshll.u32 %s4029_s28, 4  ;;  %s4030_s12 = smov [#allocation12]   ;;  %s4155_s29 = int_to_ptr.vmem [resolvable:$true] %s371_s29 }
  0x18   : > { %s4869_s25 = scalar_select %p4143_p3, 1, 0 }
  0x19   : > { %p3442_p4 = pneg %p4143_p3  ;;  %s395_s13 = sshll.u32 %s4030_s12, 4  ;;  %s4157_s13 = int_to_ptr.vmem [resolvable:$true] %s395_s13 }
  0x1a   : > { %s4871_s4 = sld [smem:[#allocation26_spill]] }
  0x1b   : > { %p4151_p5 = pnand %p3442_p4, %p4138_p1 }
  0x1d   : > { %p4167_p7 = pneg %p4151_p5 }
  0x20   : > { %s3702_s16 = scalar_lea.hbm %s4871_s4, 16 }
  0x21   : > { %p3703_p6 = scmp.ne.s32.totalorder %s4871_s4, %s3702_s16  ;;  %p3709_p10 = scmp.lt.u32.totalorder %s3702_s16, %s4871_s4 }
  0x23   : > { %p3705_p8 = pnand %p4167_p7, %p3703_p6 }
  0x25   : > { %p3706_p9 = pneg %p3705_p8 }
  0x27   : > { %p3711_p11 = pnand %p3709_p10, %p3706_p9 }
  0x29   : > { %3714 = shalt.err (!%p3711_p11)
}
  0x2a   : > { %s3715_s14 = scalar_lea.vmem %s350_s27, 16  ;;  %s3722_s23 = scalar_lea.vmem %s350_s27, 32 }
  0x2b   : > { %p3716_p12 = scmp.ne.s32.totalorder %s350_s27, %s3715_s14  ;;  %p3723_p2 = scmp.lt.s32.totalorder %s350_s27, %s350_s27 }
  0x2c   : > { %p3724_p4 = scmp.lt.s32.totalorder %s3722_s23, %s3715_s14 }
  0x2d   : > { %p3718_p13 = pnand %p3716_p12, %p4167_p7 }
  0x2e   : > { %p3725_p3 = por %p3724_p4, %p3723_p2 }
  0x2f   : > { %p3719_p0 = pneg %p3718_p13 }
  0x31   : > { %p3726_p1 = pnand %p3725_p3, %p3719_p0 }
  0x33   : > { %3729 = shalt.err (!%p3726_p1)
}
  0x34   : > { %3445 = dma.hbm_to_vmem [thread:$0]  (!%p4151_p5), %s4871_s4, 16, %s350_s27, [#allocation7]  }
  0x35   : > { %s4873_s6 = sld [smem:[#allocation28_spill]] }
  0x3b   : > { %s3730_s12 = scalar_lea.hbm %s4873_s6, 16 }
  0x3c   : > { %p3731_p6 = scmp.ne.s32.totalorder %s4873_s6, %s3730_s12  ;;  %p3737_p1 = scmp.lt.u32.totalorder %s3730_s12, %s4873_s6 }
  0x3e   : > { %p3733_p8 = pnand %p3731_p6, %p4167_p7 }
  0x40   : > { %p3734_p9 = pneg %p3733_p8 }
  0x42   : > { %p3739_p3 = pnand %p3737_p1, %p3734_p9 }
  0x44   : > { %3742 = shalt.err (!%p3739_p3)
}
  0x45   : > { %s3743_s27 = scalar_lea.vmem %s4155_s29, 16  ;;  %s3750_s2 = scalar_lea.vmem %s4155_s29, 32 }
  0x46   : > { %p3744_p10 = scmp.ne.s32.totalorder %s4155_s29, %s3743_s27  ;;  %p3751_p13 = scmp.lt.s32.totalorder %s4155_s29, %s4155_s29 }
  0x47   : > { %p3752_p0 = scmp.lt.s32.totalorder %s3750_s2, %s3743_s27 }
  0x48   : > { %p3746_p11 = pnand %p3744_p10, %p4167_p7 }
  0x49   : > { %p3753_p2 = por %p3752_p0, %p3751_p13 }
  0x4a   : > { %p3747_p12 = pneg %p3746_p11 }
  0x4c   : > { %p3754_p4 = pnand %p3753_p2, %p3747_p12 }
  0x4e   : > { %3757 = shalt.err (!%p3754_p4)
}
  0x4f   : > { %3451 = dma.hbm_to_vmem [thread:$0]  (!%p4151_p5), %s4873_s6, 16, %s4155_s29, [#allocation10]  }
  0x50   : > { %s4874_s8 = sld [smem:[#allocation29_spill]] }
  0x56   : > { %s3758_s16 = scalar_lea.hbm %s4874_s8, 16 }
  0x57   : > { %p3759_p6 = scmp.ne.s32.totalorder %s4874_s8, %s3758_s16  ;;  %p3765_p1 = scmp.lt.u32.totalorder %s3758_s16, %s4874_s8 }
  0x59   : > { %p3761_p8 = pnand %p3759_p6, %p4167_p7 }
  0x5b   : > { %p3762_p9 = pneg %p3761_p8 }
  0x5d   : > { %p3767_p3 = pnand %p3765_p1, %p3762_p9 }
  0x5f   : > { %3770 = shalt.err (!%p3767_p3)
}
  0x60   : > { %s3771_s29 = scalar_lea.vmem %s4157_s13, 16  ;;  %s3778_s2 = scalar_lea.vmem %s4157_s13, 32 }
  0x61   : > { %p3772_p10 = scmp.ne.s32.totalorder %s4157_s13, %s3771_s29  ;;  %p3779_p13 = scmp.lt.s32.totalorder %s4157_s13, %s4157_s13 }
  0x62   : > { %p3780_p0 = scmp.lt.s32.totalorder %s3778_s2, %s3771_s29 }
  0x63   : > { %p3774_p11 = pnand %p3772_p10, %p4167_p7 }
  0x64   : > { %p3781_p2 = por %p3780_p0, %p3779_p13 }
  0x65   : > { %p3775_p12 = pneg %p3774_p11 }
  0x67   : > { %p3782_p4 = pnand %p3781_p2, %p3775_p12 }
  0x69   : > { %3785 = shalt.err (!%p3782_p4)
}
  0x6a   : > { %3457 = dma.hbm_to_vmem [thread:$0]  (!%p4151_p5), %s4874_s8, 16, %s4157_s13, [#allocation13]  }
  0x6b   : > { %s4031_s26 = smov [#allocation8]   ;;  %s4032_s16 = smov [#allocation11]  }
  0x6c   : > { %s360_s11 = sshll.u32 %s4031_s26, 4  ;;  %s381_s12 = sshll.u32 %s4032_s16, 4  ;;  %s361_s11 = int_to_ptr.vmem [resolvable:$true] %s360_s11  ;;  %s382_s12 = int_to_ptr.vmem [resolvable:$true] %s381_s12 }
  0x6d   : > { %s4875_s5 = sld [smem:[#allocation27_spill]] }
  0x73   : > { %s3786_s27 = scalar_lea.hbm %s4875_s5, 16 }
  0x74   : > { %p3787_p6 = scmp.ne.s32.totalorder %s4875_s5, %s3786_s27  ;;  %p3793_p1 = scmp.lt.u32.totalorder %s3786_s27, %s4875_s5 }
  0x76   : > { %p3789_p8 = pnand %p3787_p6, %p4167_p7 }
  0x78   : > { %p3790_p9 = pneg %p3789_p8 }
  0x7a   : > { %p3795_p3 = pnand %p3793_p1, %p3790_p9 }
  0x7c   : > { %3798 = shalt.err (!%p3795_p3)
}
  0x7d   : > { %s3799_s13 = scalar_lea.vmem %s361_s11, 16  ;;  %s3806_s15 = scalar_lea.vmem %s361_s11, 32 }
  0x7e   : > { %p3800_p10 = scmp.ne.s32.totalorder %s361_s11, %s3799_s13  ;;  %p3807_p13 = scmp.lt.s32.totalorder %s361_s11, %s361_s11 }
  0x7f   : > { %p3808_p0 = scmp.lt.s32.totalorder %s3806_s15, %s3799_s13 }
  0x80   : > { %p3802_p11 = pnand %p3800_p10, %p4167_p7 }
  0x81   : > { %p3809_p2 = por %p3808_p0, %p3807_p13 }
  0x82   : > { %p3803_p12 = pneg %p3802_p11 }
  0x84   : > { %p3810_p4 = pnand %p3809_p2, %p3803_p12 }
  0x86   : > { %3813 = shalt.err (!%p3810_p4)
}
  0x87   : > { %3448 = dma.hbm_to_vmem [thread:$0]  (!%p4151_p5), %s4875_s5, 16, %s361_s11, [#allocation7]  }
  0x88   : > { %s3814_s23 = scalar_lea.hbm %s4850_s7, 2048 }
  0x89   : > { %p3815_p6 = scmp.ne.s32.totalorder %s4850_s7, %s3814_s23  ;;  %p3821_p1 = scmp.lt.u32.totalorder %s3814_s23, %s4850_s7 }
  0x8b   : > { %p3817_p8 = pnand %p3815_p6, %p4167_p7 }
  0x8d   : > { %p3818_p9 = pneg %p3817_p8 }
  0x8f   : > { %p3823_p3 = pnand %p3821_p1, %p3818_p9 }
  0x91   : > { %3826 = shalt.err (!%p3823_p3)
}
  0x92   : > { %s3827_s13 = scalar_lea.vmem %s382_s12, 2048  ;;  %p3835_p13 = scmp.lt.s32.totalorder %s382_s12, %s382_s12 }
  0x93   : > { %p3828_p10 = scmp.ne.s32.totalorder %s382_s12, %s3827_s13  ;;  %p3836_p0 = scmp.lt.s32.totalorder %s3827_s13, %s3827_s13 }
  0x95   : > { %p3830_p11 = pnand %p3828_p10, %p4167_p7  ;;  %p3837_p2 = por %p3836_p0, %p3835_p13 }
  0x97   : > { %p3831_p12 = pneg %p3830_p11 }
  0x99   : > { %p3838_p4 = pnand %p3837_p2, %p3831_p12 }
  0x9b   : > { %3841 = shalt.err (!%p3838_p4)
}
  0x9c   : > { %s4033_s11 = smov 128   ;;  %s4034_s15 = smov 8  }
  0x9d   : > { %3454 = dma.hbm_to_vmem [thread:$0]  (!%p4151_p5), %s4850_s7, 2048, %s382_s12, [#allocation10], %s4033_s11, %s4033_s11, %s4034_s15  }
  0x9e   : > { %s4035_s4 = smov [#allocation14]   ;;  %s4036_s23 = smov [#allocation15]  }
  0x9f   : > { %s405_s14 = sshll.u32 %s4035_s4, 4  ;;  %s419_s27 = sshll.u32 %s4036_s23, 4  ;;  %s406_s14 = int_to_ptr.vmem [resolvable:$true] %s405_s14  ;;  %s420_s27 = int_to_ptr.vmem [resolvable:$true] %s419_s27 }
  0xa0   : > { %s3842_s3 = scalar_lea.hbm %s4852_s9, 2048 }
  0xa1   : > { %p3843_p6 = scmp.ne.s32.totalorder %s4852_s9, %s3842_s3  ;;  %p3849_p1 = scmp.lt.u32.totalorder %s3842_s3, %s4852_s9 }
  0xa3   : > { %p3845_p8 = pnand %p3843_p6, %p4167_p7 }
  0xa5   : > { %p3846_p9 = pneg %p3845_p8 }
  0xa7   : > { %p3851_p3 = pnand %p3849_p1, %p3846_p9 }
  0xa9   : > { %3854 = shalt.err (!%p3851_p3)
}
  0xaa   : > { %s3855_s12 = scalar_lea.vmem %s406_s14, 2048  ;;  %p3863_p13 = scmp.lt.s32.totalorder %s406_s14, %s406_s14 }
  0xab   : > { %p3856_p10 = scmp.ne.s32.totalorder %s406_s14, %s3855_s12  ;;  %p3864_p0 = scmp.lt.s32.totalorder %s3855_s12, %s3855_s12 }
  0xad   : > { %p3858_p11 = pnand %p3856_p10, %p4167_p7  ;;  %p3865_p2 = por %p3864_p0, %p3863_p13 }
  0xaf   : > { %p3859_p12 = pneg %p3858_p11 }
  0xb1   : > { %p3866_p4 = pnand %p3865_p2, %p3859_p12 }
  0xb3   : > { %3869 = shalt.err (!%p3866_p4)
}
  0xb4   : > { %3460 = dma.hbm_to_vmem [thread:$0]  (!%p4151_p5), %s4852_s9, 2048, %s406_s14, [#allocation13], %s4033_s11, %s4033_s11, %s4034_s15  }
  0xb5   : > { %s3870_s16 = scalar_lea.hbm %s4853_s10, 16 }
  0xb6   : > { %p3871_p6 = scmp.ne.s32.totalorder %s4853_s10, %s3870_s16  ;;  %p3877_p1 = scmp.lt.u32.totalorder %s3870_s16, %s4853_s10 }
  0xb8   : > { %p3873_p8 = pnand %p3871_p6, %p4167_p7 }
  0xba   : > { %p3874_p9 = pneg %p3873_p8 }
  0xbc   : > { %p3879_p3 = pnand %p3877_p1, %p3874_p9 }
  0xbe   : > { %3882 = shalt.err (!%p3879_p3)
}
  0xbf   : > { %s3883_s3 = scalar_lea.vmem %s420_s27, 16  ;;  %s3890_s11 = scalar_lea.vmem %s420_s27, 32 }
  0xc0   : > { %p3884_p10 = scmp.ne.s32.totalorder %s420_s27, %s3883_s3  ;;  %p3891_p13 = scmp.lt.s32.totalorder %s420_s27, %s420_s27 }
  0xc1   : > { %p3892_p0 = scmp.lt.s32.totalorder %s3890_s11, %s3883_s3 }
  0xc2   : > { %p3886_p11 = pnand %p3884_p10, %p4167_p7 }
  0xc3   : > { %p3893_p2 = por %p3892_p0, %p3891_p13 }
  0xc4   : > { %p3887_p12 = pneg %p3886_p11 }
  0xc6   : > { %p3894_p4 = pnand %p3893_p2, %p3887_p12 }
  0xc8   : > { %3897 = shalt.err (!%p3894_p4)
}
  0xc9   : > { %3463 = dma.hbm_to_vmem [thread:$0]  (!%p4151_p5), %s4853_s10, 16, %s420_s27, [#allocation16]  }
  0xca   : > { %s2707_s28 = sadd.s32 4294967294, %s4026_s22   ;;  %s43_s13 = sadd.s32 1, %s4022_s21 }
  0xcb   : > { %s52_s30 = sadd.s32 1, %s4014_s19  ;;  %p45_p7 = scmp.ge.s32.totalorder %s43_s13, 6 }
  0xcc   : > { %p59_p6 = scmp.ne.s32.totalorder %s4014_s19, %s4010_s18  ;;  %p60_p8 = scmp.eq.s32.totalorder %s4026_s22, 0 }
  0xcd   : > { %p65_p9 = scmp.ne.s32.totalorder %s4010_s18, %s4006_s17  ;;  %s4896_s13 = smov (%p45_p7, %s43_s13), 0 }
  0xce   : > { %p4313_p1 = por %p60_p8, %p59_p6  ;;  %p4877_p3 = scmp.ne.s32.totalorder %s4868_s24, 0 }
  0xcf   : > { %s47_s5 = ssub.s32 %s4022_s21, %s4896_s13  ;;  %s4879_s26 = sadd.s32 4294967295, %s4026_s22  }
  0xd0   : > { %p4319_p5 = por %p4877_p3, %p65_p9  ;;  %p314_p10 = scmp.eq.s32.totalorder %s4879_s26, 5 }
  0xd1   : > { %p50_p11 = scmp.eq.s32.totalorder %s47_s5, 0  ;;  %p320_p12 = scmp.eq.s32.totalorder %s2707_s28, 5 }
  0xd2   : > { %p4327_p13 = por %p314_p10, %p59_p6  ;;  %p3479_p0 = scmp.lt.s32.totalorder %s4026_s22, 6 }
  0xd3   : > { %s4333_s8 = scalar_select %p50_p11, %s4014_s19, %s52_s30  }
  0xd4   : > { %s4880_s6 = scalar_select %p4327_p13, 1, 0 }
  0xd5   : > { %p4335_p2 = por %p320_p12, %p65_p9  ;;  %s430_s4 = sand.u32 1, %s4014_s19  }
  0xd6   : > { %s3407_s23 = smul.u32 384, %s430_s4  ;;  %p4343_p4 = pnand %p3479_p0, %p4313_p1 }
  0xd7   : > { %s4881_s16 = scalar_select %p4335_p2, 1, 0 }
  0xd8   : > { %s3408_s29 = smul.u32 6144, %s4022_s21  ;;  %s434_s14 = scalar_lea.vmem [#allocation3], %s3407_s23 }
  0xd9   : > { %s444_s28 = sshll.u32 %s434_s14, 4  ;;  %s4354_s30 = scalar_lea.sflag [#allocation4], %s430_s4  ;;  %s4352_s28 = int_to_ptr.vmem [resolvable:$true] %s444_s28 }
  0xda   : > { %s4350_s15 = scalar_lea.hbm %s4843_s0, %s3408_s29  ;;  %p3900_p6 = pneg %p4343_p4 }
  0xdb   : > { %s3898_s12 = scalar_lea.hbm %s4350_s15, 6144  ;;  %s3903_s29 = scalar_lea.hbm %s4843_s0, 36864 }
  0xdc   : > { %p3899_p7 = scmp.ne.s32.totalorder %s4350_s15, %s3898_s12  ;;  %p3904_p1 = scmp.lt.u32.totalorder %s4350_s15, %s4843_s0 }
  0xdd   : > { %p3905_p3 = scmp.lt.u32.totalorder %s3903_s29, %s3898_s12  ;;  %p3907_p11 = scmp.lt.u32.totalorder %s3898_s12, %s4350_s15 }
  0xde   : > { %p3901_p8 = pnand %p3900_p6, %p3899_p7 }
  0xdf   : > { %p3906_p10 = por %p3905_p3, %p3904_p1 }
  0xe0   : > { %p3902_p9 = pneg %p3901_p8 }
  0xe1   : > { %p3908_p12 = por %p3907_p11, %p3906_p10 }
  0xe3   : > { %p3909_p0 = pnand %p3908_p12, %p3902_p9 }
  0xe5   : > { %3912 = shalt.err (!%p3909_p0)
}
  0xe6   : > { %s3913_s4 = scalar_lea.vmem %s4352_s28, 6144  ;;  %s4037_s23 = smov [#allocation3]  }
  0xe7   : > { %p3914_p7 = scmp.ne.s32.totalorder %s4352_s28, %s3913_s4  ;;  %s3918_s14 = sshll.u32 %s4037_s23, 4  ;;  %s3919_s14 = int_to_ptr.vmem [resolvable:$false] %s3918_s14 }
  0xe8   : > { %s3920_s5 = scalar_lea.vmem %s3919_s14, 12288  ;;  %p3921_p13 = scmp.lt.s32.totalorder %s4352_s28, %s3919_s14 }
  0xe9   : > { %p3916_p8 = pnand %p3914_p7, %p3900_p6  ;;  %p3922_p1 = scmp.lt.s32.totalorder %s3920_s5, %s3913_s4 }
  0xeb   : > { %p3917_p2 = pneg %p3916_p8  ;;  %p3923_p3 = por %p3922_p1, %p3921_p13 }
  0xed   : > { %p3924_p10 = pnand %p3923_p3, %p3917_p2 }
  0xef   : > { %3927 = shalt.err (!%p3924_p10)
}
  0xf0   : > { %s4038_s12 = smov 384   ;;  %s4039_s26 = smov 24  }
  0xf1   : > { %3467 = dma.hbm_to_vmem [thread:$0]  (!%p4343_p4), %s4350_s15, 6144, %s4352_s28, %s4354_s30, %s4038_s12, %s4038_s12, %s4039_s26  }
  0xf2   : > { %p4883_p6 = scmp.ne.s32.totalorder %s4869_s25, 0 }
  0xf3   : > { %s4385_s29 = sand.u32 (!%p4883_p6), 1, %s4010_s18  }
  0xf4   : > { %474 = sbr.rel (%p4883_p6) target bundleno = 1312 (0x520), region = 64  ;;  %s477_s11 = scalar_lea.sflag (!%p4883_p6), [#allocation4], %s4385_s29 }
  0xf5   : > { %s3409_s3 = smul.u32 (!%p4883_p6), 384, %s4385_s29 }
  0xf7   : > { %s4389_s4 = scalar_lea.vmem (!%p4883_p6), [#allocation3], %s3409_s3 }
  0xfb   : > { %3981 = dma.done.wait (%p4319_p5), %s477_s11, 6144  }
  0xfc   : > { %3983 = vsyncadd (%p4319_p5), %s477_s11, 4294961152  ;;  %p4884_p13 = scmp.ne.s32.totalorder %s4868_s24, 0 }
  0xfe   : > { %3985 = dma.done.wait (%p4884_p13), [#allocation7], 32  }
  0xff   : > { %3987 = vsyncadd (%p4884_p13), [#allocation7], 4294967264 }
 0x100   : > { %3989 = dma.done.wait (%p4884_p13), [#allocation10], 2064  }
 0x101   : > { %3991 = vsyncadd (%p4884_p13), [#allocation10], 4294965232 }
 0x102   : > { %3993 = dma.done.wait (%p4884_p13), [#allocation13], 2064  }
 0x103   : > { %3995 = vsyncadd (%p4884_p13), [#allocation13], 4294965232 }
 0x104   : > { %3997 = dma.done.wait (%p4884_p13), [#allocation16], 16  }
 0x105   : > { %3999 = vsyncadd (%p4884_p13), [#allocation16], 4294967280  ;;  %v3550_v0 = vld [vmem:[%s4844_s1 + $0x40] sm:$0xff]   ;;  %v3554_v4 = vld [vmem:[%s4844_s1 + $0x48] sm:$0xff]   ;;  %vm1750_vm0 = vcmask 1040384   ;;  %s2730_s3 = sshll.u32 %s4018_s20, 4 }
 0x106   : > { %v3551_v1 = vld [vmem:[%s4844_s1 + $0xc0] sm:$0xff]   ;;  %2873 = vmatprep.subr.bf16.mxu0 %v3550_v0  ;;  %v3555_v5 = vld [vmem:[%s4844_s1 + $0xc8] sm:$0xff]   ;;  %v3558_v8 = vld [vmem:[%s4844_s1 + $0x50] sm:$0xff]   ;;  %p571_p5 = scmp.lt.s32.totalorder %s2730_s3, 95  ;;  %s4885_s2 = sld [smem:[#allocation24_spill]]  ;;  %vm588_vm1 = vcmask 7168  }
 0x107   : > { %v3552_v2 = vld [vmem:[%s4844_s1] sm:$0xff]   ;;  %2937 = vmatprep.subr.bf16.mxu1 %v3551_v1  ;;  %v3556_v6 = vld [vmem:[%s4844_s1 + $0x8] sm:$0xff]   ;;  %v3559_v9 = vld [vmem:[%s4844_s1 + $0xd0] sm:$0xff]   ;;  %s4886_s30 = sld [smem:[#allocation25_spill]]  ;;  %s2729_s14 = sshll.u32 %s4385_s29, 7 }
 0x108   : > { %v3553_v3 = vld [vmem:[%s4844_s1 + $0x80] sm:$0xff]   ;;  %2874 = vmatpush3.bf16.msra.mxu0 %v3552_v2  ;;  %v3557_v7 = vld [vmem:[%s4844_s1 + $0x88] sm:$0xff]   ;;  %v3560_v10 = vld [vmem:[%s4844_s1 + $0x10] sm:$0xff]   ;;  %s4898_s3 = smov (!%p571_p5, %s2730_s3), 95  ;;  %s4770_s24 = scalar_lea.vmem [#allocation17], %s2729_s14 }
 0x109   : > { %2938 = vmatpush3.bf16.msra.mxu1 %v3553_v3  ;;  %2875 = vmatprep.subr.bf16.mxu0 %v3554_v4  ;;  %v3561_v11 = vld [vmem:[%s4844_s1 + $0x90] sm:$0xff]   ;;  %v3562_v12 = vld [vmem:[%s4844_s1 + $0x58] sm:$0xff]   ;;  %v3566_v16 = vld [vmem:[%s4844_s1 + $0x60] sm:$0xff]   ;;  %s2731_s11 = sshll.u32 %s4898_s3, 3  ;;  %s2872_s5 = sshll.u32 %s4018_s20, 11 }
 0x10a   : > { %2939 = vmatprep.subr.bf16.mxu1 %v3555_v5  ;;  %v3563_v13 = vld [vmem:[%s4844_s1 + $0xd8] sm:$0xff]   ;;  %v3567_v17 = vld [vmem:[%s4844_s1 + $0xe0] sm:$0xff]   ;;  %v3570_v20 = vld [vmem:[%s4844_s1 + $0x68] sm:$0xff]   ;;  %s2516_s12 = sshll.u32 %s4770_s24, 4  ;;  %s2503_s27 = scalar_lea.sflag [#allocation5], %s4385_s29  ;;  %s4793_s12 = int_to_ptr.vmem [resolvable:$true] %s2516_s12 }
 0x10b   : > { %v3564_v14 = vld [vmem:[%s4844_s1 + $0x18] sm:$0xff]   ;;  %v3568_v18 = vld [vmem:[%s4844_s1 + $0x20] sm:$0xff]   ;;  %v3571_v21 = vld [vmem:[%s4844_s1 + $0xe8] sm:$0xff]   ;;  %p4888_p4 = scmp.ne.s32.totalorder %s4880_s6, 0  ;;  %s4041_s20 = smov [#allocation17]  }
 0x10c   : > { %2876 = vmatpush3.bf16.msra.mxu0 %v3556_v6  ;;  %v3565_v15 = vld [vmem:[%s4844_s1 + $0x98] sm:$0xff]   ;;  %v3569_v19 = vld [vmem:[%s4844_s1 + $0xa0] sm:$0xff]   ;;  %v3572_v22 = vld [vmem:[%s4844_s1 + $0x28] sm:$0xff]   ;;  %s4614_s15 = scalar_lea.vmem %s4885_s2, %s2731_s11  ;;  %s3928_s2 = scalar_lea.vmem %s4793_s12, 2048 }
 0x10d   : > { %2940 = vmatpush3.bf16.msra.mxu1 %v3557_v7  ;;  %2877 = vmatprep.subr.bf16.mxu0 %v3558_v8  ;;  %v3573_v23 = vld [vmem:[%s4844_s1 + $0xa8] sm:$0xff]   ;;  %v3574_v24 = vld [vmem:[%s4844_s1 + $0x70] sm:$0xff]   ;;  %v3578_v28 = vld [vmem:[%s4844_s1 + $0x78] sm:$0xff]   ;;  %s4699_s23 = scalar_lea.vmem %s4886_s30, %s2731_s11  ;;  %s4887_s11 = sld [smem:[#allocation30_spill]] }
 0x10e   : > { %2941 = vmatprep.subr.bf16.mxu1 %v3559_v9  ;;  %v3575_v25 = vld [vmem:[%s4844_s1 + $0xf0] sm:$0xff]   ;;  %v3579_v29 = vld [vmem:[%s4844_s1 + $0xf8] sm:$0xff]   ;;  %v3585_v34 = vld [vmem:[%s4389_s4 + $0x8] ss:$24 sps:$4 sm:$0xff]   ;;  %p3929_p2 = scmp.ne.s32.totalorder %s4793_s12, %s3928_s2 }
 0x10f   : > { %v3576_v26 = vld [vmem:[%s4844_s1 + $0x30] sm:$0xff]   ;;  %v3580_v30 = vld [vmem:[%s4844_s1 + $0x38] sm:$0xff]   ;;  %v3587_v35 = vld [vmem:[%s4389_s4 + $0xc] ss:$24 sps:$4 sm:$0xff]  }
 0x110   : > { %2878 = vmatpush3.bf16.msra.mxu0 %v3560_v10  ;;  %v3577_v27 = vld [vmem:[%s4844_s1 + $0xb0] sm:$0xff]   ;;  %v3581_v31 = vld [vmem:[%s4844_s1 + $0xb8] sm:$0xff]   ;;  %v3588_v36 = vld [vmem:[%s4844_s1 + $0x140] sm:$0xff]   ;;  %1422 = vmatprep.mubr.bf16.mxu1 %v3587_v35  ;;  %p3930_p9 = pnand %p3929_p2, %p4888_p4 }
 0x111   : > { %2942 = vmatpush3.bf16.msra.mxu1 %v3561_v11  ;;  %2879 = vmatprep.subr.bf16.mxu0 %v3562_v12  ;;  %v3582_v32 = vld [vmem:[%s4389_s4] ss:$24 sps:$4 sm:$0xff]   ;;  %v3584_v33 = vld [vmem:[%s4389_s4 + $0x4] ss:$24 sps:$4 sm:$0xff]   ;;  %v3590_v38 = vld [vmem:[%s4389_s4 + $0x34] ss:$24 sps:$4 sm:$0xff]  }
 0x112   : > { %2943 = vmatprep.subr.bf16.mxu1 %v3563_v13  ;;  %1325 = vmatprep.mubr.bf16.mxu0 %v3584_v33  ;;  %v3589_v37 = vld [vmem:[%s4844_s1 + $0x100] sm:$0xff]   ;;  %v3592_v39 = vld [vmem:[%s4389_s4 + $0x3c] ss:$24 sps:$4 sm:$0xff]   ;;  %v3594_v40 = vld [vmem:[%s4389_s4 + $0x30] ss:$24 sps:$4 sm:$0xff]   ;;  %p3931_p11 = pneg %p3930_p9 }
 0x113   : > { %v3595_v41 = vld [vmem:[%s4389_s4 + $0x38] ss:$24 sps:$4 sm:$0xff]   ;;  %v3596_v42 = vld [vmem:[%s4844_s1 + $0x148] sm:$0xff]   ;;  %v3598_v44 = vld [vmem:[%s4389_s4 + $0x64] ss:$24 sps:$4 sm:$0xff]   ;;  %s4791_s25 = scalar_lea.hbm %s4887_s11, %s2872_s5 }
 0x114   : > { %2880 = vmatpush3.bf16.msra.mxu0 %v3564_v14  ;;  %v3597_v43 = vld [vmem:[%s4844_s1 + $0x108] sm:$0xff]   ;;  %v3604_v46 = vld [vmem:[%s4844_s1 + $0x150] sm:$0xff]   ;;  %v3602_v48 = vld [vmem:[%s4389_s4 + $0x60] ss:$24 sps:$4 sm:$0xff]  }
 0x115   : > { %2944 = vmatpush3.bf16.msra.mxu1 %v3565_v15  ;;  %2881 = vmatprep.subr.bf16.mxu0 %v3566_v16  ;;  %v3600_v45 = vld [vmem:[%s4389_s4 + $0x6c] ss:$24 sps:$4 sm:$0xff]   ;;  %v3605_v47 = vld [vmem:[%s4844_s1 + $0x110] sm:$0xff]   ;;  %v3603_v49 = vld [vmem:[%s4389_s4 + $0x68] ss:$24 sps:$4 sm:$0xff]  }
 0x116   : > { %2945 = vmatprep.subr.bf16.mxu1 %v3567_v17  ;;  %v3606_v50 = vld [vmem:[%s4389_s4 + $0x94] ss:$24 sps:$4 sm:$0xff]   ;;  %v3612_v52 = vld [vmem:[%s4844_s1 + $0x158] sm:$0xff]   ;;  %v3620_v54 = vld [vmem:[%s4844_s1 + $0x160] sm:$0xff]  }
 0x117   : > { %v3608_v51 = vld [vmem:[%s4389_s4 + $0x9c] ss:$24 sps:$4 sm:$0xff]   ;;  %v3621_v55 = vld [vmem:[%s4844_s1 + $0x120] sm:$0xff]   ;;  %v3610_v56 = vld [vmem:[%s4389_s4 + $0x90] ss:$24 sps:$4 sm:$0xff]  }
 0x118   : > { %2882 = vmatpush3.bf16.msra.mxu0 %v3568_v18  ;;  %v3613_v53 = vld [vmem:[%s4844_s1 + $0x118] sm:$0xff]   ;;  %v3616_v59 = vld [vmem:[%s4389_s4 + $0xcc] ss:$24 sps:$4 sm:$0xff]   ;;  %v3619_v63 = vld [vmem:[%s4389_s4 + $0xc8] ss:$24 sps:$4 sm:$0xff]  }
 0x119   : > { %2946 = vmatpush3.bf16.msra.mxu1 %v3569_v19  ;;  %2883 = vmatprep.subr.bf16.mxu0 %v3570_v20  ;;  %v3611_v57 = vld [vmem:[%s4389_s4 + $0x98] ss:$24 sps:$4 sm:$0xff]   ;;  %v3614_v58 = vld [vmem:[%s4389_s4 + $0xc4] ss:$24 sps:$4 sm:$0xff]   ;;  %v3628_v60 = vld [vmem:[%s4844_s1 + $0x168] sm:$0xff]  }
 0x11a   : > { %2947 = vmatprep.subr.bf16.mxu1 %v3571_v21  ;;  %v3629_v61 = vld [vmem:[%s4844_s1 + $0x128] sm:$0xff]   ;;  %v3618_v62 = vld [vmem:[%s4389_s4 + $0xc0] ss:$24 sps:$4 sm:$0xff]   ;;  %v3636_v0 = vld [vmem:[%s4844_s1 + $0x170] sm:$0xff]  }
 0x11b   : > { %v3637_v1 = vld [vmem:[%s4844_s1 + $0x130] sm:$0xff]   ;;  %v3644_v4 = vld [vmem:[%s4844_s1 + $0x178] sm:$0xff]   ;;  %v3632_v9 = vld [vmem:[%s4389_s4 + $0x12c] ss:$24 sps:$4 sm:$0xff]  }
 0x11c   : > { %2884 = vmatpush3.bf16.msra.mxu0 %v3572_v22  ;;  %v3622_v2 = vld [vmem:[%s4389_s4 + $0xf4] ss:$24 sps:$4 sm:$0xff]   ;;  %v3645_v5 = vld [vmem:[%s4844_s1 + $0x138] sm:$0xff]   ;;  %v3626_v6 = vld [vmem:[%s4389_s4 + $0xf0] ss:$24 sps:$4 sm:$0xff]  }
 0x11d   : > { %2948 = vmatpush3.bf16.msra.mxu1 %v3573_v23  ;;  %2885 = vmatprep.subr.bf16.mxu0 %v3574_v24  ;;  %v3624_v3 = vld [vmem:[%s4389_s4 + $0xfc] ss:$24 sps:$4 sm:$0xff]   ;;  %v3627_v7 = vld [vmem:[%s4389_s4 + $0xf8] ss:$24 sps:$4 sm:$0xff]   ;;  %v3635_v11 = vld [vmem:[%s4389_s4 + $0x128] ss:$24 sps:$4 sm:$0xff]  }
 0x11e   : > { %2949 = vmatprep.subr.bf16.mxu1 %v3575_v25  ;;  %v3630_v8 = vld [vmem:[%s4389_s4 + $0x124] ss:$24 sps:$4 sm:$0xff]   ;;  %v3634_v10 = vld [vmem:[%s4389_s4 + $0x120] ss:$24 sps:$4 sm:$0xff]   ;;  %v3638_v12 = vld [vmem:[%s4389_s4 + $0x154] ss:$24 sps:$4 sm:$0xff]  }
 0x11f   : > { %v3640_v13 = vld [vmem:[%s4389_s4 + $0x15c] ss:$24 sps:$4 sm:$0xff]   ;;  %v3642_v14 = vld [vmem:[%s4389_s4 + $0x150] ss:$24 sps:$4 sm:$0xff]   ;;  %v3651_v19 = vld [vmem:[%s4389_s4 + $0x40] ss:$24 sps:$4 sm:$0xff]  }
 0x120   : > { %2886 = vmatpush3.bf16.msra.mxu0 %v3576_v26  ;;  %v3643_v15 = vld [vmem:[%s4389_s4 + $0x158] ss:$24 sps:$4 sm:$0xff]   ;;  %v3648_v16 = vld [vmem:[%s4389_s4 + $0x14] ss:$24 sps:$4 sm:$0xff]   ;;  %v3649_v18 = vld [vmem:[%s4389_s4 + $0x44] ss:$24 sps:$4 sm:$0xff]  }
 0x121   : > { %2950 = vmatpush3.bf16.msra.mxu1 %v3577_v27  ;;  %2887 = vmatprep.subr.bf16.mxu0 %v3578_v28  ;;  %v3646_v17 = vld [vmem:[%s4389_s4 + $0x10] ss:$24 sps:$4 sm:$0xff]   ;;  %v3652_v20 = vld [vmem:[%s4389_s4 + $0x74] ss:$24 sps:$4 sm:$0xff]   ;;  %v3655_v22 = vld [vmem:[%s4389_s4 + $0xa4] ss:$24 sps:$4 sm:$0xff]  }
 0x122   : > { %2951 = vmatprep.subr.bf16.mxu1 %v3579_v29  ;;  %v3654_v21 = vld [vmem:[%s4389_s4 + $0x70] ss:$24 sps:$4 sm:$0xff]   ;;  %v3657_v23 = vld [vmem:[%s4389_s4 + $0xa0] ss:$24 sps:$4 sm:$0xff]   ;;  %v3658_v24 = vld [vmem:[%s4389_s4 + $0xd4] ss:$24 sps:$4 sm:$0xff]  }
 0x123   : > { %v3660_v25 = vld [vmem:[%s4389_s4 + $0xd0] ss:$24 sps:$4 sm:$0xff]   ;;  %v3661_v26 = vld [vmem:[%s4389_s4 + $0x104] ss:$24 sps:$4 sm:$0xff]   ;;  %v3663_v27 = vld [vmem:[%s4389_s4 + $0x100] ss:$24 sps:$4 sm:$0xff]  }
 0x124   : > { %2888 = vmatpush3.bf16.msra.mxu0 %v3580_v30  ;;  %v1701_v28 = vld [vmem:[#allocation8] sm:$0x1]  ;;  %v3664_v29 = vld [vmem:[%s4389_s4 + $0x134] ss:$24 sps:$4 sm:$0xff]   ;;  %v3666_v30 = vld [vmem:[%s4389_s4 + $0x130] ss:$24 sps:$4 sm:$0xff]  }
 0x125   : > { %2952 = vmatpush3.bf16.msra.mxu1 %v3581_v31  ;;  %3001 = vmatprep.subr.bf16.mxu0 %v3588_v36  ;;  %v3667_v31 = vld [vmem:[%s4389_s4 + $0x164] ss:$24 sps:$4 sm:$0xff]   ;;  %v1687_v35 = vld [vmem:[%s4614_s15 + $0x10] sm:$0xff] }
 0x126   : > { %3163 = vmatprep.subr.msk.mxu1 %vm1750_vm0, %v1701_v28  ;;  %v1685_v33 = vld [vmem:[%s4614_s15] sm:$0xff]  ;;  %v1688_v36 = vld [vmem:[%s4614_s15 + $0x18] sm:$0xff] }
 0x127   : > { %1326 = vmatmul.mubr.bf16.vlgmr.msra.gmra.mrb[0].mxu0 %v3582_v32  ;;  %v3669_v32 = vld [vmem:[%s4389_s4 + $0x160] ss:$24 sps:$4 sm:$0xff]  }
 0x128   : > { %1423 = vmatmul.mubr.bf16.vlgmr.msra.gmra.mrb[0].mxu1 %v3585_v34  ;;  %3002 = vmatpush3.bf16.msra.mxu0 %v3589_v37  ;;  %v1686_v34 = vld [vmem:[%s4614_s15 + $0x8] sm:$0xff]  ;;  %v1689_v37 = vld [vmem:[%s4614_s15 + $0x20] sm:$0xff] }
 0x129   : > { %1333 = vmatprep.mubr.bf16.mxu0 %v3590_v38  ;;  %1430 = vmatprep.mubr.bf16.mxu1 %v3592_v39  ;;  %v1690_v38 = vld [vmem:[%s4614_s15 + $0x28] sm:$0xff]  ;;  %v1691_v39 = vld [vmem:[%s4614_s15 + $0x30] sm:$0xff] }
 0x12a   : > { %3003 = vmatprep.subr.bf16.mxu0 %v3596_v42  ;;  %3164 = vmatpush3.msk.msra.mxu1 %vm1750_vm0, %v1701_v28  ;;  %v1693_v42 = vld [vmem:[%s4614_s15 + $0x40] sm:$0xff] }
 0x12c   : > { %3004 = vmatpush3.bf16.msra.mxu0 %v3597_v43  ;;  %v1694_v43 = vld [vmem:[%s4614_s15 + $0x48] sm:$0xff] }
 0x12d   : > { %3005 = vmatprep.subr.bf16.mxu0 %v3604_v46  ;;  %v1697_v46 = vld [vmem:[%s4614_s15 + $0x60] sm:$0xff] }
 0x12f   : > { %1334 = vmatmul.mubr.bf16.gmra.mrb[4].mxu0 %v3594_v40  ;;  %v4040_v40 = vmov 0.0  }
 0x130   : > { %1431 = vmatmul.mubr.bf16.gmra.mrb[4].mxu1 %v3595_v41  ;;  %1341 = vmatprep.mubr.bf16.mxu0 %v3598_v44  ;;  %589 = vst.msk [vmem:[#allocation2] sm:$0xff] %vm588_vm1, %v4040_v40  ;;  %590 = vst.msk [vmem:[#allocation2 + $0x8] sm:$0xff] %vm588_vm1, %v4040_v40  ;;  %v1692_v41 = vld [vmem:[%s4614_s15 + $0x38] sm:$0xff]  ;;  %v1695_v44 = vld [vmem:[%s4614_s15 + $0x50] sm:$0xff] }
 0x131   : > { %1438 = vmatprep.mubr.bf16.mxu1 %v3600_v45  ;;  %3006 = vmatpush3.bf16.msra.mxu0 %v3605_v47  ;;  %591 = vst.msk [vmem:[#allocation2 + $0x10] sm:$0xff] %vm588_vm1, %v4040_v40  ;;  %592 = vst.msk [vmem:[#allocation2 + $0x18] sm:$0xff] %vm588_vm1, %v4040_v40  ;;  %v1696_v45 = vld [vmem:[%s4614_s15 + $0x58] sm:$0xff]  ;;  %v1698_v47 = vld [vmem:[%s4614_s15 + $0x68] sm:$0xff] }
 0x132   : > { %3007 = vmatprep.subr.bf16.mxu0 %v3612_v52  ;;  %593 = vst.msk [vmem:[#allocation2 + $0x20] sm:$0xff] %vm588_vm1, %v4040_v40  ;;  %594 = vst.msk [vmem:[#allocation2 + $0x28] sm:$0xff] %vm588_vm1, %v4040_v40 }
 0x133   : > { %595 = vst.msk [vmem:[#allocation2 + $0x30] sm:$0xff] %vm588_vm1, %v4040_v40  ;;  %596 = vst.msk [vmem:[#allocation2 + $0x38] sm:$0xff] %vm588_vm1, %v4040_v40 }
 0x134   : > { %597 = vst.msk [vmem:[#allocation2 + $0x40] sm:$0xff] %vm588_vm1, %v4040_v40  ;;  %598 = vst.msk [vmem:[#allocation2 + $0x48] sm:$0xff] %vm588_vm1, %v4040_v40 }
 0x135   : > { %3008 = vmatpush3.bf16.msra.mxu0 %v3613_v53  ;;  %599 = vst.msk [vmem:[#allocation2 + $0x50] sm:$0xff] %vm588_vm1, %v4040_v40  ;;  %600 = vst.msk [vmem:[#allocation2 + $0x58] sm:$0xff] %vm588_vm1, %v4040_v40 }
 0x136   : > { %3009 = vmatprep.subr.bf16.mxu0 %v3620_v54  ;;  %601 = vst.msk [vmem:[#allocation2 + $0x60] sm:$0xff] %vm588_vm1, %v4040_v40  ;;  %602 = vst.msk [vmem:[#allocation2 + $0x68] sm:$0xff] %vm588_vm1, %v4040_v40 }
 0x137   : > { %1342 = vmatmul.mubr.bf16.gmra.mrb[8].mxu0 %v3602_v48  ;;  %603 = vst.msk [vmem:[#allocation2 + $0x70] sm:$0xff] %vm588_vm1, %v4040_v40  ;;  %604 = vst.msk [vmem:[#allocation2 + $0x78] sm:$0xff] %vm588_vm1, %v4040_v40  ;;  %v1699_v48 = vld [vmem:[%s4614_s15 + $0x70] sm:$0xff]  ;;  %v2142_v40 = vld [vmem:[#allocation11 + $0x40] sm:$0xff] }
 0x138   : > { %1439 = vmatmul.mubr.bf16.gmra.mrb[8].mxu1 %v3603_v49  ;;  %1349 = vmatprep.mubr.bf16.mxu0 %v3606_v50  ;;  %v1700_v49 = vld [vmem:[%s4614_s15 + $0x78] sm:$0xff]  ;;  %v1684_v50 = vld [vmem:[#allocation6] sm:$0x1]  ;;  %s3932_s15 = sshll.u32 %s4041_s20, 4  ;;  %s3933_s15 = int_to_ptr.vmem [resolvable:$false] %s3932_s15 }
 0x139   : > { %1446 = vmatprep.mubr.bf16.mxu1 %v3608_v51  ;;  %3010 = vmatpush3.bf16.msra.mxu0 %v3621_v55  ;;  %s3934_s4 = scalar_lea.vmem %s3933_s15, 4096  ;;  %p3935_p12 = scmp.lt.s32.totalorder %s4793_s12, %s3933_s15 }
 0x13a   : > { %3011 = vmatprep.subr.bf16.mxu0 %v3628_v60  ;;  %3189 = vmatprep.subr.msk.mxu1 %vm1750_vm0, %v1684_v50  ;;  %p3936_p0 = scmp.lt.s32.totalorder %s3934_s4, %s3928_s2 }
 0x13c   : > { %p3937_p7 = por %p3936_p0, %p3935_p12 }
 0x13d   : > { %3012 = vmatpush3.bf16.msra.mxu0 %v3629_v61 }
 0x13e   : > { %3013 = vmatprep.subr.bf16.mxu0 %v3636_v0  ;;  %p3938_p8 = pnand %p3937_p7, %p3931_p11 }
 0x13f   : > { %1350 = vmatmul.mubr.bf16.gmra.mrb[12].mxu0 %v3610_v56 }
 0x140   : > { %1447 = vmatmul.mubr.bf16.gmra.mrb[12].mxu1 %v3611_v57  ;;  %1357 = vmatprep.mubr.bf16.mxu0 %v3614_v58 }
 0x141   : > { %1454 = vmatprep.mubr.bf16.mxu1 %v3616_v59  ;;  %3014 = vmatpush3.bf16.msra.mxu0 %v3637_v1 }
 0x142   : > { %3015 = vmatprep.subr.bf16.mxu0 %v3644_v4 }
 0x145   : > { %3016 = vmatpush3.bf16.msra.mxu0 %v3645_v5 }
 0x147   : > { %1358 = vmatmul.mubr.bf16.gmra.mrb[16].mxu0 %v3618_v62 }
 0x148   : > { %1455 = vmatmul.mubr.bf16.gmra.mrb[16].mxu1 %v3619_v63  ;;  %1365 = vmatprep.mubr.bf16.mxu0 %v3622_v2 }
 0x149   : > { %1462 = vmatprep.mubr.bf16.mxu1 %v3624_v3 }
 0x14f   : > { %1366 = vmatmul.mubr.bf16.gmra.mrb[20].mxu0 %v3626_v6 }
 0x150   : > { %1463 = vmatmul.mubr.bf16.gmra.mrb[20].mxu1 %v3627_v7  ;;  %1373 = vmatprep.mubr.bf16.mxu0 %v3630_v8 }
 0x151   : > { %1470 = vmatprep.mubr.bf16.mxu1 %v3632_v9 }
 0x157   : > { %1374 = vmatmul.mubr.bf16.gmra.mrb[24].mxu0 %v3634_v10 }
 0x158   : > { %1471 = vmatmul.mubr.bf16.gmra.mrb[24].mxu1 %v3635_v11  ;;  %1381 = vmatprep.mubr.bf16.mxu0 %v3638_v12  ;;  %v2134_v12 = vld [vmem:[#allocation11] sm:$0xff] }
 0x159   : > { %1478 = vmatprep.mubr.bf16.mxu1 %v3640_v13  ;;  %v2135_v13 = vld [vmem:[#allocation11 + $0x8] sm:$0xff] }
 0x15f   : > { %1382 = vmatmul.mubr.bf16.gmra.mrb[28].mxu0 %v3642_v14  ;;  %v2136_v14 = vld [vmem:[#allocation11 + $0x10] sm:$0xff] }
 0x160   : > { %1479 = vmatmul.mubr.bf16.gmra.mrb[28].mxu1 %v3643_v15  ;;  %1519 = vmatprep.mubr.bf16.mxu0 %v3648_v16 }
 0x161   : > { %3165 = vmatprep.mubr.msk.f32.mxu1 %vm588_vm1, %v1685_v33 }
 0x167   : > { %1520 = vmatmul.mubr.bf16.vlgmr.msra.gmra.mrb[32].mxu0 %v3646_v17  ;;  %v3327_v17 = vpack.c.bf16 %v2135_v13, %v2134_v12 }
 0x168   : > { %1527 = vmatprep.mubr.bf16.mxu0 %v3649_v18  ;;  %3166 = vmatmul.mubr.msk.f32.vlgmr.msra.gmra.mrb[32].mxu1 %vm588_vm1, %v1686_v34  ;;  %v2137_v18 = vld [vmem:[#allocation11 + $0x18] sm:$0xff] }
 0x169   : > { %3168 = vmatprep.mubr.msk.f32.mxu1 %vm588_vm1, %v1687_v35  ;;  %3190 = vmatpush3.msk.msra.mxu1 %vm1750_vm0, %v1684_v50  ;;  %v2144_v50 = vld [vmem:[#allocation11 + $0x50] sm:$0xff] }
 0x16a   : > { %3328 = vmatprep.subr.bf16.mxu0 %v3327_v17 }
 0x16b   : > { %3330 = vmatpush3.bf16.msra.mxu0 %v3327_v17 }
 0x16c   : > { %3169 = vmatmul.mubr.msk.f32.gmra.mrb[34].mxu1 %vm588_vm1, %v1688_v36 }
 0x16d   : > { %3171 = vmatprep.mubr.msk.f32.mxu1 %vm588_vm1, %v1689_v37 }
 0x16f   : > { %1528 = vmatmul.mubr.bf16.gmra.mrb[36].mxu0 %v3651_v19  ;;  %v3331_v19 = vpack.c.bf16 %v2137_v18, %v2136_v14 }
 0x170   : > { %1535 = vmatprep.mubr.bf16.mxu0 %v3652_v20  ;;  %3172 = vmatmul.mubr.msk.f32.gmra.mrb[36].mxu1 %vm588_vm1, %v1690_v38  ;;  %v2138_v20 = vld [vmem:[#allocation11 + $0x20] sm:$0xff] }
 0x171   : > { %3174 = vmatprep.mubr.msk.f32.mxu1 %vm588_vm1, %v1691_v39  ;;  %3332 = vmatprep.subr.bf16.mxu0 %v3331_v19 }
 0x172   : > { %3334 = vmatpush3.bf16.msra.mxu0 %v3331_v19 }
 0x174   : > { %3175 = vmatmul.mubr.msk.f32.gmra.mrb[38].mxu1 %vm588_vm1, %v1692_v41  ;;  %v2143_v41 = vld [vmem:[#allocation11 + $0x48] sm:$0xff] }
 0x175   : > { %3177 = vmatprep.mubr.msk.f32.mxu1 %vm588_vm1, %v1693_v42 }
 0x177   : > { %1536 = vmatmul.mubr.bf16.gmra.mrb[40].mxu0 %v3654_v21  ;;  %v2139_v21 = vld [vmem:[#allocation11 + $0x28] sm:$0xff] }
 0x178   : > { %1543 = vmatprep.mubr.bf16.mxu0 %v3655_v22  ;;  %3178 = vmatmul.mubr.msk.f32.gmra.mrb[40].mxu1 %vm588_vm1, %v1694_v43 }
 0x179   : > { %3180 = vmatprep.mubr.msk.f32.mxu1 %vm588_vm1, %v1695_v44 }
 0x17c   : > { %3181 = vmatmul.mubr.msk.f32.gmra.mrb[42].mxu1 %vm588_vm1, %v1696_v45 }
 0x17d   : > { %3183 = vmatprep.mubr.msk.f32.mxu1 %vm588_vm1, %v1697_v46  ;;  %v3343_v46 = vpack.c.bf16 %v2143_v41, %v2142_v40 }
 0x17f   : > { %1544 = vmatmul.mubr.bf16.gmra.mrb[44].mxu0 %v3657_v23 }
 0x180   : > { %1551 = vmatprep.mubr.bf16.mxu0 %v3658_v24  ;;  %3184 = vmatmul.mubr.msk.f32.gmra.mrb[44].mxu1 %vm588_vm1, %v1698_v47 }
 0x181   : > { %3186 = vmatprep.mubr.msk.f32.mxu1 %vm588_vm1, %v1699_v48 }
 0x184   : > { %3187 = vmatmul.mubr.msk.f32.gmra.mrb[46].mxu1 %vm588_vm1, %v1700_v49 }
 0x187   : > { %1552 = vmatmul.mubr.bf16.gmra.mrb[48].mxu0 %v3660_v25 }
 0x188   : > { %1559 = vmatprep.mubr.bf16.mxu0 %v3661_v26  ;;  %v3335_v26 = vpack.c.bf16 %v2139_v21, %v2138_v20 }
 0x18a   : > { %3336 = vmatprep.subr.bf16.mxu0 %v3335_v26 }
 0x18b   : > { %3338 = vmatpush3.bf16.msra.mxu0 %v3335_v26 }
 0x18f   : > { %1560 = vmatmul.mubr.bf16.gmra.mrb[52].mxu0 %v3663_v27 }
 0x190   : > { %1567 = vmatprep.mubr.bf16.mxu0 %v3664_v29 }
 0x197   : > { %1568 = vmatmul.mubr.bf16.gmra.mrb[56].mxu0 %v3666_v30  ;;  %v2140_v30 = vld [vmem:[#allocation11 + $0x30] sm:$0xff] }
 0x198   : > { %1575 = vmatprep.mubr.bf16.mxu0 %v3667_v31  ;;  %v2141_v31 = vld [vmem:[#allocation11 + $0x38] sm:$0xff] }
 0x199   : > { %v3339_v39 = vpack.c.bf16 %v2141_v31, %v2140_v30 }
 0x19b   : > { %3340 = vmatprep.subr.bf16.mxu0 %v3339_v39 }
 0x19c   : > { %3342 = vmatpush3.bf16.msra.mxu0 %v3339_v39 }
 0x19d   : > { %3344 = vmatprep.subr.bf16.mxu0 %v3343_v46 }
 0x19f   : > { %1576 = vmatmul.mubr.bf16.gmra.mrb[60].mxu0 %v3669_v32 }
 0x1a0   : > { %3346 = vmatpush3.bf16.msra.mxu0 %v3343_v46 }
 0x1fa   : > { %v2889_v51 = vpop.f32.mrb[0].mxu0 }
 0x1fb   : > { %v2953_v52 = vpop.f32.mrb[0].mxu1  ;;  %v2890_v53 = vpop.f32.mrb[1].mxu0 }
 0x1fc   : > { %v2891_v54 = vadd.f32 %v2890_v53, %v2889_v51  ;;  %v2954_v55 = vpop.f32.mrb[1].mxu1  ;;  %v2892_v56 = vpop.f32.mrb[2].mxu0  ;;  %v2145_v51 = vld [vmem:[#allocation11 + $0x58] sm:$0xff] }
 0x1fd   : > { %v2955_v57 = vadd.f32 %v2954_v55, %v2953_v52  ;;  %v2956_v58 = vpop.f32.mrb[2].mxu1  ;;  %v2893_v59 = vpop.f32.mrb[3].mxu0 }
 0x1fe   : > { %v2894_v60 = vadd.f32 %v2893_v59, %v2892_v56  ;;  %v2957_v61 = vpop.f32.mrb[3].mxu1  ;;  %v3347_v59 = vpack.c.bf16 %v2145_v51, %v2144_v50 }
 0x1ff   : > { %v4666_v62 = vadd.f32 %v2955_v57, %v2891_v54  ;;  %v2958_v63 = vadd.f32 %v2957_v61, %v2956_v58  ;;  %v2147_v61 = vld [vmem:[#allocation11 + $0x68] sm:$0xff] }
 0x200   : > { %3348 = vmatprep.subr.bf16.mxu0 %v3347_v59 }
 0x201   : > { %v4668_v0 = vadd.f32 %v2958_v63, %v2894_v60  ;;  %v2146_v60 = vld [vmem:[#allocation11 + $0x60] sm:$0xff]  ;;  %3350 = vmatpush3.bf16.msra.mxu0 %v3347_v59 }
 0x202   : > { %v2895_v1 = vpop.f32.mrb[4].mxu0 }
 0x203   : > { %v2959_v2 = vpop.f32.mrb[4].mxu1  ;;  %v2896_v3 = vpop.f32.mrb[5].mxu0 }
 0x204   : > { %v2897_v4 = vadd.f32 %v2896_v3, %v2895_v1  ;;  %v2960_v5 = vpop.f32.mrb[5].mxu1  ;;  %v2898_v6 = vpop.f32.mrb[6].mxu0 }
 0x205   : > { %v2961_v7 = vadd.f32 %v2960_v5, %v2959_v2  ;;  %v2962_v8 = vpop.f32.mrb[6].mxu1  ;;  %v2899_v9 = vpop.f32.mrb[7].mxu0 }
 0x206   : > { %v2900_v10 = vadd.f32 %v2899_v9, %v2898_v6  ;;  %v2963_v11 = vpop.f32.mrb[7].mxu1 }
 0x207   : > { %v4670_v15 = vadd.f32 %v2961_v7, %v2897_v4  ;;  %v2964_v16 = vadd.f32 %v2963_v11, %v2962_v8  ;;  %v3351_v4 = vpack.c.bf16 %v2147_v61, %v2146_v60 }
 0x209   : > { %v4672_v22 = vadd.f32 %v2964_v16, %v2900_v10  ;;  %3352 = vmatprep.subr.bf16.mxu0 %v3351_v4 }
 0x20a   : > { %v2901_v23 = vpop.f32.mrb[8].mxu0  ;;  %3354 = vmatpush3.bf16.msra.mxu0 %v3351_v4 }
 0x20b   : > { %v2965_v24 = vpop.f32.mrb[8].mxu1  ;;  %v2902_v25 = vpop.f32.mrb[9].mxu0 }
 0x20c   : > { %v2903_v27 = vadd.f32 %v2902_v25, %v2901_v23  ;;  %v2966_v28 = vpop.f32.mrb[9].mxu1  ;;  %v2904_v29 = vpop.f32.mrb[10].mxu0 }
 0x20d   : > { %v2967_v32 = vadd.f32 %v2966_v28, %v2965_v24  ;;  %v2968_v33 = vpop.f32.mrb[10].mxu1  ;;  %v2905_v34 = vpop.f32.mrb[11].mxu0 }
 0x20e   : > { %v2906_v35 = vadd.f32 %v2905_v34, %v2904_v29  ;;  %v2969_v36 = vpop.f32.mrb[11].mxu1 }
 0x20f   : > { %v4674_v37 = vadd.f32 %v2967_v32, %v2903_v27  ;;  %v2970_v38 = vadd.f32 %v2969_v36, %v2968_v33 }
 0x211   : > { %v4676_v42 = vadd.f32 %v2970_v38, %v2906_v35 }
 0x212   : > { %v2907_v43 = vpop.f32.mrb[12].mxu0 }
 0x213   : > { %v2971_v44 = vpop.f32.mrb[12].mxu1  ;;  %v2908_v45 = vpop.f32.mrb[13].mxu0 }
 0x214   : > { %v2909_v47 = vadd.f32 %v2908_v45, %v2907_v43  ;;  %v2972_v48 = vpop.f32.mrb[13].mxu1  ;;  %v2910_v49 = vpop.f32.mrb[14].mxu0 }
 0x215   : > { %v2973_v52 = vadd.f32 %v2972_v48, %v2971_v44  ;;  %v2974_v53 = vpop.f32.mrb[14].mxu1  ;;  %v2911_v54 = vpop.f32.mrb[15].mxu0 }
 0x216   : > { %v2912_v55 = vadd.f32 %v2911_v54, %v2910_v49  ;;  %v2975_v56 = vpop.f32.mrb[15].mxu1 }
 0x217   : > { %v4678_v57 = vadd.f32 %v2973_v52, %v2909_v47  ;;  %v2976_v58 = vadd.f32 %v2975_v56, %v2974_v53 }
 0x219   : > { %v4680_v63 = vadd.f32 %v2976_v58, %v2912_v55 }
 0x21a   : > { %v2913_v1 = vpop.f32.mrb[16].mxu0 }
 0x21b   : > { %v2977_v2 = vpop.f32.mrb[16].mxu1  ;;  %v2914_v3 = vpop.f32.mrb[17].mxu0 }
 0x21c   : > { %v2915_v5 = vadd.f32 %v2914_v3, %v2913_v1  ;;  %v2978_v6 = vpop.f32.mrb[17].mxu1  ;;  %v2916_v7 = vpop.f32.mrb[18].mxu0  ;;  %v1620_v3 = vld [vmem:[%s4699_s23] sm:$0xff] }
 0x21d   : > { %v2979_v8 = vadd.f32 %v2978_v6, %v2977_v2  ;;  %v2980_v9 = vpop.f32.mrb[18].mxu1  ;;  %v2917_v10 = vpop.f32.mrb[19].mxu0  ;;  %3670 = vrcp.f32 %v1620_v3  ;;  %v1626_v3 = vld [vmem:[%s4699_s23 + $0x30] sm:$0xff] }
 0x21e   : > { %v2918_v11 = vadd.f32 %v2917_v10, %v2916_v7  ;;  %v2981_v12 = vpop.f32.mrb[19].mxu1  ;;  %v1621_v7 = vld [vmem:[%s4699_s23 + $0x8] sm:$0xff] }
 0x21f   : > { %v4682_v13 = vadd.f32 %v2979_v8, %v2915_v5  ;;  %v2982_v14 = vadd.f32 %v2981_v12, %v2980_v9  ;;  %v605_v8 = vld [vmem:[#allocation2] sm:$0xff]  ;;  %v606_v12 = vld [vmem:[#allocation2 + $0x8] sm:$0xff]  ;;  %3672 = vrcp.f32 %v1621_v7 }
 0x221   : > { %v4684_v16 = vadd.f32 %v2982_v14, %v2918_v11 }
 0x222   : > { %v2919_v17 = vpop.f32.mrb[20].mxu0 }
 0x223   : > { %v2983_v18 = vpop.f32.mrb[20].mxu1  ;;  %v2920_v19 = vpop.f32.mrb[21].mxu0 }
 0x224   : > { %v2921_v20 = vadd.f32 %v2920_v19, %v2919_v17  ;;  %v2984_v21 = vpop.f32.mrb[21].mxu1  ;;  %v2922_v23 = vpop.f32.mrb[22].mxu0 }
 0x225   : > { %v2985_v24 = vadd.f32 %v2984_v21, %v2983_v18  ;;  %v2986_v25 = vpop.f32.mrb[22].mxu1  ;;  %v2923_v26 = vpop.f32.mrb[23].mxu0 }
 0x226   : > { %v2924_v27 = vadd.f32 %v2923_v26, %v2922_v23  ;;  %v2987_v28 = vpop.f32.mrb[23].mxu1  ;;  %v607_v26 = vld [vmem:[#allocation2 + $0x10] sm:$0xff] }
 0x227   : > { %v4686_v29 = vadd.f32 %v2985_v24, %v2921_v20  ;;  %v2988_v30 = vadd.f32 %v2987_v28, %v2986_v25  ;;  %v1622_v20 = vld [vmem:[%s4699_s23 + $0x10] sm:$0xff]  ;;  %v1623_v25 = vld [vmem:[%s4699_s23 + $0x18] sm:$0xff] }
 0x228   : > { %3674 = vrcp.f32 %v1622_v20 }
 0x229   : > { %v4688_v31 = vadd.f32 %v2988_v30, %v2924_v27  ;;  %v3671_v30 = vpop.eup %3670  ;;  %3676 = vrcp.f32 %v1623_v25  ;;  %v1628_v25 = vld [vmem:[%s4699_s23 + $0x40] sm:$0xff] }
 0x22a   : > { %v2925_v32 = vpop.f32.mrb[24].mxu0 }
 0x22b   : > { %v2989_v33 = vpop.f32.mrb[24].mxu1  ;;  %v2926_v34 = vpop.f32.mrb[25].mxu0 }
 0x22c   : > { %v2927_v35 = vadd.f32 %v2926_v34, %v2925_v32  ;;  %v2990_v36 = vpop.f32.mrb[25].mxu1  ;;  %v2928_v38 = vpop.f32.mrb[26].mxu0 }
 0x22d   : > { %v2991_v39 = vadd.f32 %v2990_v36, %v2989_v33  ;;  %v2992_v40 = vpop.f32.mrb[26].mxu1  ;;  %v2929_v41 = vpop.f32.mrb[27].mxu0 }
 0x22e   : > { %v2930_v43 = vadd.f32 %v2929_v41, %v2928_v38  ;;  %v2993_v44 = vpop.f32.mrb[27].mxu1  ;;  %v3673_v34 = vpop.eup %3672 }
 0x22f   : > { %v4690_v45 = vadd.f32 %v2991_v39, %v2927_v35  ;;  %v2994_v46 = vadd.f32 %v2993_v44, %v2992_v40  ;;  %v1624_v40 = vld [vmem:[%s4699_s23 + $0x20] sm:$0xff] }
 0x230   : > { %3678 = vrcp.f32 %v1624_v40 }
 0x231   : > { %v4692_v47 = vadd.f32 %v2994_v46, %v2930_v43 }
 0x232   : > { %v2931_v48 = vpop.f32.mrb[28].mxu0 }
 0x233   : > { %v2995_v49 = vpop.f32.mrb[28].mxu1  ;;  %v2932_v50 = vpop.f32.mrb[29].mxu0 }
 0x234   : > { %v2933_v51 = vadd.f32 %v2932_v50, %v2931_v48  ;;  %v2996_v52 = vpop.f32.mrb[29].mxu1  ;;  %v2934_v53 = vpop.f32.mrb[30].mxu0  ;;  %v1625_v48 = vld [vmem:[%s4699_s23 + $0x28] sm:$0xff] }
 0x235   : > { %v2997_v54 = vadd.f32 %v2996_v52, %v2995_v49  ;;  %v2998_v55 = vpop.f32.mrb[30].mxu1  ;;  %v2935_v56 = vpop.f32.mrb[31].mxu0  ;;  %v609_v49 = vld [vmem:[#allocation2 + $0x20] sm:$0xff]  ;;  %3680 = vrcp.f32 %v1625_v48 }
 0x236   : > { %v2936_v58 = vadd.f32 %v2935_v56, %v2934_v53  ;;  %v2999_v59 = vpop.f32.mrb[31].mxu1  ;;  %v3675_v52 = vpop.eup %3674  ;;  %v610_v53 = vld [vmem:[#allocation2 + $0x28] sm:$0xff]  ;;  %3682 = vrcp.f32 %v1626_v3 }
 0x237   : > { %v4701_v60 = vadd.f32 %v2997_v54, %v2933_v51  ;;  %v3000_v61 = vadd.f32 %v2999_v59, %v2998_v55  ;;  %v3677_v56 = vpop.eup %3676 }
 0x239   : > { %v4703_v1 = vadd.f32 %v3000_v61, %v2936_v58 }
 0x23a   : > { %v3017_v2 = vpop.f32.mrb[32].mxu0 }
 0x23b   : > { %v3018_v4 = vpop.f32.mrb[33].mxu0 }
 0x23c   : > { %v3019_v5 = vadd.f32 %v3018_v4, %v3017_v2  ;;  %v3020_v6 = vpop.f32.mrb[34].mxu0 }
 0x23d   : > { %v3021_v9 = vpop.f32.mrb[35].mxu0 }
 0x23e   : > { %v1522_v10 = vadd.f32 %v3019_v5, %v4666_v62  ;;  %v3022_v11 = vadd.f32 %v3021_v9, %v3020_v6  ;;  %v611_v9 = vld [vmem:[#allocation2 + $0x30] sm:$0xff] }
 0x240   : > { %v1584_v14 = vadd.f32 %v1522_v10, %v605_v8  ;;  %v1525_v17 = vadd.f32 %v3022_v11, %v4668_v0  ;;  %v608_v0 = vld [vmem:[#allocation2 + $0x18] sm:$0xff] }
 0x241   : > { %v1627_v8 = vld [vmem:[%s4699_s23 + $0x38] sm:$0xff] }
 0x242   : > { %1601 = vst.msk [vmem:[#allocation2] sm:$0xff] %vm588_vm1, %v1584_v14  ;;  %v1585_v18 = vadd.f32 %v1525_v17, %v606_v12  ;;  %v3023_v19 = vpop.f32.mrb[36].mxu0  ;;  %v3679_v12 = vpop.eup %3678  ;;  %v612_v14 = vld [vmem:[#allocation2 + $0x38] sm:$0xff]  ;;  %3684 = vrcp.f32 %v1627_v8 }
 0x243   : > { %v3024_v21 = vpop.f32.mrb[37].mxu0  ;;  %3686 = vrcp.f32 %v1628_v25  ;;  %v1634_v25 = vld [vmem:[%s4699_s23 + $0x70] sm:$0xff] }
 0x244   : > { %1602 = vst.msk [vmem:[#allocation2 + $0x8] sm:$0xff] %vm588_vm1, %v1585_v18  ;;  %v3025_v23 = vadd.f32 %v3024_v21, %v3023_v19  ;;  %v3026_v24 = vpop.f32.mrb[38].mxu0  ;;  %v3681_v19 = vpop.eup %3680 }
 0x245   : > { %v3027_v62 = vpop.f32.mrb[39].mxu0 }
 0x246   : > { %v1530_v27 = vadd.f32 %v3025_v23, %v4670_v15  ;;  %v3028_v28 = vadd.f32 %v3027_v62, %v3026_v24 }
 0x248   : > { %v1586_v32 = vadd.f32 %v1530_v27, %v607_v26  ;;  %v1533_v33 = vadd.f32 %v3028_v28, %v4672_v22 }
 0x249   : > { %v1652_v35 = vld [vmem:[#allocation2] sm:$0xff] }
 0x24a   : > { %1603 = vst.msk [vmem:[#allocation2 + $0x10] sm:$0xff] %vm588_vm1, %v1586_v32  ;;  %v1587_v36 = vadd.f32 %v1533_v33, %v608_v0  ;;  %v3029_v38 = vpop.f32.mrb[40].mxu0  ;;  %v1668_v39 = vmul.f32 %v3671_v30, %v1652_v35  ;;  %v1629_v30 = vld [vmem:[%s4699_s23 + $0x48] sm:$0xff]  ;;  %v613_v0 = vld [vmem:[#allocation2 + $0x40] sm:$0xff] }
 0x24b   : > { %v3030_v41 = vpop.f32.mrb[41].mxu0  ;;  %v1653_v43 = vld [vmem:[#allocation2 + $0x8] sm:$0xff]  ;;  %3688 = vrcp.f32 %v1629_v30  ;;  %v619_v30 = vld [vmem:[#allocation2 + $0x70] sm:$0xff] }
 0x24c   : > { %1604 = vst.msk [vmem:[#allocation2 + $0x18] sm:$0xff] %vm588_vm1, %v1587_v36  ;;  %v3031_v15 = vadd.f32 %v3030_v41, %v3029_v38  ;;  %v3032_v44 = vpop.f32.mrb[42].mxu0  ;;  %3191 = vmatprep.mubr.msk.f32.mxu1 %vm588_vm1, %v1668_v39  ;;  %v1669_v46 = vmul.f32 %v3673_v34, %v1653_v43  ;;  %v3683_v34 = vpop.eup %3682  ;;  %v614_v35 = vld [vmem:[#allocation2 + $0x48] sm:$0xff] }
 0x24d   : > { %v3033_v22 = vpop.f32.mrb[43].mxu0  ;;  %v3685_v39 = vpop.eup %3684 }
 0x24e   : > { %v1538_v50 = vadd.f32 %v3031_v15, %v4674_v37  ;;  %v3034_v51 = vadd.f32 %v3033_v22, %v3032_v44  ;;  %3192 = vmatmul.mubr.msk.f32.vlgmr.msra.gmra.mrb[32].mxu1 %vm588_vm1, %v1669_v46  ;;  %v1630_v44 = vld [vmem:[%s4699_s23 + $0x50] sm:$0xff] }
 0x24f   : > { %3690 = vrcp.f32 %v1630_v44 }
 0x250   : > { %v1588_v54 = vadd.f32 %v1538_v50, %v609_v49  ;;  %v1541_v55 = vadd.f32 %v3034_v51, %v4676_v42  ;;  %v1631_v50 = vld [vmem:[%s4699_s23 + $0x58] sm:$0xff]  ;;  %v615_v51 = vld [vmem:[#allocation2 + $0x50] sm:$0xff] }
 0x251   : > { %v1654_v58 = vld [vmem:[#allocation2 + $0x10] sm:$0xff]  ;;  %3692 = vrcp.f32 %v1631_v50  ;;  %v2318_v50 = vld [vmem:[#allocation14] sm:$0xff] }
 0x252   : > { %1605 = vst.msk [vmem:[#allocation2 + $0x20] sm:$0xff] %vm588_vm1, %v1588_v54  ;;  %v1589_v59 = vadd.f32 %v1541_v55, %v610_v53  ;;  %v3035_v61 = vpop.f32.mrb[44].mxu0  ;;  %v1670_v2 = vmul.f32 %v3675_v52, %v1654_v58  ;;  %v3687_v54 = vpop.eup %3686  ;;  %v616_v55 = vld [vmem:[#allocation2 + $0x58] sm:$0xff] }
 0x253   : > { %v3036_v4 = vpop.f32.mrb[45].mxu0  ;;  %v1655_v37 = vld [vmem:[#allocation2 + $0x18] sm:$0xff] }
 0x254   : > { %1606 = vst.msk [vmem:[#allocation2 + $0x28] sm:$0xff] %vm588_vm1, %v1589_v59  ;;  %v3037_v5 = vadd.f32 %v3036_v4, %v3035_v61  ;;  %v3038_v6 = vpop.f32.mrb[46].mxu0  ;;  %3194 = vmatprep.mubr.msk.f32.mxu1 %vm588_vm1, %v1670_v2  ;;  %v1671_v7 = vmul.f32 %v3677_v56, %v1655_v37  ;;  %v1632_v37 = vld [vmem:[%s4699_s23 + $0x60] sm:$0xff] }
 0x255   : > { %v3039_v42 = vpop.f32.mrb[47].mxu0  ;;  %v3689_v59 = vpop.eup %3688  ;;  %3694 = vrcp.f32 %v1632_v37 }
 0x256   : > { %v1546_v10 = vadd.f32 %v3037_v5, %v4678_v57  ;;  %v3040_v11 = vadd.f32 %v3039_v42, %v3038_v6  ;;  %3195 = vmatmul.mubr.msk.f32.gmra.mrb[34].mxu1 %vm588_vm1, %v1671_v7  ;;  %v617_v42 = vld [vmem:[#allocation2 + $0x60] sm:$0xff] }
 0x258   : > { %v1590_v17 = vadd.f32 %v1546_v10, %v611_v9  ;;  %v1549_v18 = vadd.f32 %v3040_v11, %v4680_v63  ;;  %v1633_v9 = vld [vmem:[%s4699_s23 + $0x68] sm:$0xff] }
 0x259   : > { %v1656_v20 = vld [vmem:[#allocation2 + $0x20] sm:$0xff]  ;;  %3696 = vrcp.f32 %v1633_v9 }
 0x25a   : > { %1607 = vst.msk [vmem:[#allocation2 + $0x30] sm:$0xff] %vm588_vm1, %v1590_v17  ;;  %v1591_v21 = vadd.f32 %v1549_v18, %v612_v14  ;;  %v3041_v23 = vpop.f32.mrb[48].mxu0  ;;  %v1672_v24 = vmul.f32 %v3679_v12, %v1656_v20  ;;  %v3691_v12 = vpop.eup %3690  ;;  %v618_v14 = vld [vmem:[#allocation2 + $0x68] sm:$0xff]  ;;  %3698 = vrcp.f32 %v1634_v25 }
 0x25b   : > { %v3042_v26 = vpop.f32.mrb[49].mxu0  ;;  %v1657_v57 = vld [vmem:[#allocation2 + $0x28] sm:$0xff] }
 0x25c   : > { %1608 = vst.msk [vmem:[#allocation2 + $0x38] sm:$0xff] %vm588_vm1, %v1591_v21  ;;  %v3043_v62 = vadd.f32 %v3042_v26, %v3041_v23  ;;  %v3044_v27 = vpop.f32.mrb[50].mxu0  ;;  %3197 = vmatprep.mubr.msk.f32.mxu1 %vm588_vm1, %v1672_v24  ;;  %v1673_v28 = vmul.f32 %v3681_v19, %v1657_v57  ;;  %v3693_v19 = vpop.eup %3692 }
 0x25d   : > { %v3045_v63 = vpop.f32.mrb[51].mxu0 }
 0x25e   : > { %v1554_v32 = vadd.f32 %v3043_v62, %v4682_v13  ;;  %v3046_v33 = vadd.f32 %v3045_v63, %v3044_v27  ;;  %3198 = vmatmul.mubr.msk.f32.gmra.mrb[36].mxu1 %vm588_vm1, %v1673_v28  ;;  %v1635_v28 = vld [vmem:[%s4699_s23 + $0x78] sm:$0xff] }
 0x25f   : > { %3700 = vrcp.f32 %v1635_v28 }
 0x260   : > { %v1592_v36 = vadd.f32 %v1554_v32, %v613_v0  ;;  %v1557_v38 = vadd.f32 %v3046_v33, %v4684_v16  ;;  %v3695_v32 = vpop.eup %3694  ;;  %v620_v33 = vld [vmem:[#allocation2 + $0x78] sm:$0xff] }
 0x261   : > { %v1658_v40 = vld [vmem:[#allocation2 + $0x30] sm:$0xff] }
 0x262   : > { %1609 = vst.msk [vmem:[#allocation2 + $0x40] sm:$0xff] %vm588_vm1, %v1592_v36  ;;  %v1593_v41 = vadd.f32 %v1557_v38, %v614_v35  ;;  %v3047_v43 = vpop.f32.mrb[52].mxu0  ;;  %v1674_v15 = vmul.f32 %v3683_v34, %v1658_v40 }
 0x263   : > { %v3048_v46 = vpop.f32.mrb[53].mxu0  ;;  %v1659_v13 = vld [vmem:[#allocation2 + $0x38] sm:$0xff]  ;;  %v3697_v36 = vpop.eup %3696 }
 0x264   : > { %1610 = vst.msk [vmem:[#allocation2 + $0x48] sm:$0xff] %vm588_vm1, %v1593_v41  ;;  %v3049_v48 = vadd.f32 %v3048_v46, %v3047_v43  ;;  %v3050_v49 = vpop.f32.mrb[54].mxu0  ;;  %3200 = vmatprep.mubr.msk.f32.mxu1 %vm588_vm1, %v1674_v15  ;;  %v1675_v22 = vmul.f32 %v3685_v39, %v1659_v13  ;;  %v3699_v43 = vpop.eup %3698 }
 0x265   : > { %v3051_v16 = vpop.f32.mrb[55].mxu0 }
 0x266   : > { %v1562_v52 = vadd.f32 %v3049_v48, %v4686_v29  ;;  %v3052_v53 = vadd.f32 %v3051_v16, %v3050_v49  ;;  %3201 = vmatmul.mubr.msk.f32.gmra.mrb[38].mxu1 %vm588_vm1, %v1675_v22  ;;  %v2148_v48 = vld [vmem:[#allocation11 + $0x70] sm:$0xff]  ;;  %v2149_v49 = vld [vmem:[#allocation11 + $0x78] sm:$0xff] }
 0x267   : > { %v3355_v22 = vpack.c.bf16 %v2149_v49, %v2148_v48  ;;  %v2320_v16 = vld [vmem:[#allocation14 + $0x10] sm:$0xff] }
 0x268   : > { %v1594_v56 = vadd.f32 %v1562_v52, %v615_v51  ;;  %v1565_v58 = vadd.f32 %v3052_v53, %v4688_v31  ;;  %v2319_v51 = vld [vmem:[#allocation14 + $0x8] sm:$0xff]  ;;  %v2321_v53 = vld [vmem:[#allocation14 + $0x18] sm:$0xff] }
 0x269   : > { %v1660_v61 = vld [vmem:[#allocation2 + $0x40] sm:$0xff]  ;;  %v3701_v15 = vpop.eup %3700  ;;  %3356 = vmatprep.subr.bf16.mxu0 %v3355_v22  ;;  %v3359_v52 = vpack.c.bf16 %v2319_v51, %v2318_v50 }
 0x26a   : > { %1611 = vst.msk [vmem:[#allocation2 + $0x50] sm:$0xff] %vm588_vm1, %v1594_v56  ;;  %v1595_v2 = vadd.f32 %v1565_v58, %v616_v55  ;;  %v3053_v3 = vpop.f32.mrb[56].mxu0  ;;  %v1676_v4 = vmul.f32 %v3687_v54, %v1660_v61  ;;  %3358 = vmatpush3.bf16.msra.mxu0 %v3355_v22  ;;  %v3363_v54 = vpack.c.bf16 %v2321_v53, %v2320_v16  ;;  %v2322_v55 = vld [vmem:[#allocation14 + $0x20] sm:$0xff]  ;;  %v2323_v56 = vld [vmem:[#allocation14 + $0x28] sm:$0xff]  ;;  %v2325_v61 = vld [vmem:[#allocation14 + $0x38] sm:$0xff] }
 0x26b   : > { %v3054_v5 = vpop.f32.mrb[57].mxu0  ;;  %v1661_v29 = vld [vmem:[#allocation2 + $0x48] sm:$0xff]  ;;  %3360 = vmatprep.subr.bf16.mxu1 %v3359_v52  ;;  %v3367_v58 = vpack.c.bf16 %v2323_v56, %v2322_v55  ;;  %v2332_v55 = vld [vmem:[#allocation14 + $0x70] sm:$0xff]  ;;  %v2333_v56 = vld [vmem:[#allocation14 + $0x78] sm:$0xff] }
 0x26c   : > { %1612 = vst.msk [vmem:[#allocation2 + $0x58] sm:$0xff] %vm588_vm1, %v1595_v2  ;;  %v3055_v6 = vadd.f32 %v3054_v5, %v3053_v3  ;;  %v3056_v7 = vpop.f32.mrb[58].mxu0  ;;  %3203 = vmatprep.mubr.msk.f32.mxu1 %vm588_vm1, %v1676_v4  ;;  %v1677_v8 = vmul.f32 %v3689_v59, %v1661_v29  ;;  %3362 = vmatpush3.bf16.msra.mxu1 %v3359_v52  ;;  %v2324_v59 = vld [vmem:[#allocation14 + $0x30] sm:$0xff]  ;;  %v2326_v3 = vld [vmem:[#allocation14 + $0x40] sm:$0xff]  ;;  %v2327_v4 = vld [vmem:[#allocation14 + $0x48] sm:$0xff] }
 0x26d   : > { %v3057_v31 = vpop.f32.mrb[59].mxu0  ;;  %3364 = vmatprep.subr.bf16.mxu1 %v3363_v54  ;;  %v3371_v2 = vpack.c.bf16 %v2325_v61, %v2324_v59  ;;  %v3375_v37 = vpack.c.bf16 %v2327_v4, %v2326_v3  ;;  %v2328_v5 = vld [vmem:[#allocation14 + $0x50] sm:$0xff]  ;;  %v2329_v29 = vld [vmem:[#allocation14 + $0x58] sm:$0xff] }
 0x26e   : > { %v1570_v10 = vadd.f32 %v3055_v6, %v4690_v45  ;;  %v3058_v11 = vadd.f32 %v3057_v31, %v3056_v7  ;;  %3204 = vmatmul.mubr.msk.f32.gmra.mrb[40].mxu1 %vm588_vm1, %v1677_v8  ;;  %v3379_v6 = vpack.c.bf16 %v2329_v29, %v2328_v5  ;;  %v2330_v7 = vld [vmem:[#allocation14 + $0x60] sm:$0xff]  ;;  %v2331_v8 = vld [vmem:[#allocation14 + $0x68] sm:$0xff]  ;;  %v2865_v59 = vld [vmem:[#allocation12] ss:$0 sm:$0xff] }
 0x26f   : > { %v3383_v9 = vpack.c.bf16 %v2331_v8, %v2330_v7 }
 0x270   : > { %v1596_v17 = vadd.f32 %v1570_v10, %v617_v42  ;;  %v1573_v18 = vadd.f32 %v3058_v11, %v4692_v47  ;;  %3366 = vmatpush3.bf16.msra.mxu1 %v3363_v54  ;;  %v2864_v42 = vld [vmem:[#allocation9] ss:$0 sm:$0xff] }
 0x271   : > { %v1662_v20 = vld [vmem:[#allocation2 + $0x50] sm:$0xff]  ;;  %3368 = vmatprep.subr.bf16.mxu1 %v3367_v58 }
 0x272   : > { %1613 = vst.msk [vmem:[#allocation2 + $0x60] sm:$0xff] %vm588_vm1, %v1596_v17  ;;  %v1597_v21 = vadd.f32 %v1573_v18, %v618_v14  ;;  %v3059_v23 = vpop.f32.mrb[60].mxu0  ;;  %v1678_v24 = vmul.f32 %v3691_v12, %v1662_v20 }
 0x273   : > { %v3060_v26 = vpop.f32.mrb[61].mxu0  ;;  %v1663_v45 = vld [vmem:[#allocation2 + $0x58] sm:$0xff] }
 0x274   : > { %1614 = vst.msk [vmem:[#allocation2 + $0x68] sm:$0xff] %vm588_vm1, %v1597_v21  ;;  %v3061_v57 = vadd.f32 %v3060_v26, %v3059_v23  ;;  %v3062_v62 = vpop.f32.mrb[62].mxu0  ;;  %3206 = vmatprep.mubr.msk.f32.mxu1 %vm588_vm1, %v1678_v24  ;;  %v1679_v27 = vmul.f32 %v3693_v19, %v1663_v45  ;;  %3370 = vmatpush3.bf16.msra.mxu1 %v3367_v58 }
 0x275   : > { %v3063_v47 = vpop.f32.mrb[63].mxu0  ;;  %3372 = vmatprep.subr.bf16.mxu1 %v3371_v2  ;;  %v3387_v58 = vpack.c.bf16 %v2333_v56, %v2332_v55 }
 0x276   : > { %v1578_v0 = vadd.f32 %v3061_v57, %v4701_v60  ;;  %v3064_v63 = vadd.f32 %v3063_v47, %v3062_v62  ;;  %3207 = vmatmul.mubr.msk.f32.gmra.mrb[42].mxu1 %vm588_vm1, %v1679_v27 }
 0x278   : > { %v1598_v34 = vadd.f32 %v1578_v0, %v619_v30  ;;  %v1581_v35 = vadd.f32 %v3064_v63, %v4703_v1  ;;  %3374 = vmatpush3.bf16.msra.mxu1 %v3371_v2 }
 0x279   : > { %v1664_v38 = vld [vmem:[#allocation2 + $0x60] sm:$0xff]  ;;  %3376 = vmatprep.subr.bf16.mxu1 %v3375_v37 }
 0x27a   : > { %1615 = vst.msk [vmem:[#allocation2 + $0x70] sm:$0xff] %vm588_vm1, %v1598_v34  ;;  %v1599_v39 = vadd.f32 %v1581_v35, %v620_v33  ;;  %v1680_v40 = vmul.f32 %v3695_v32, %v1664_v38 }
 0x27b   : > { %v1665_v41 = vld [vmem:[#allocation2 + $0x68] sm:$0xff] }
 0x27c   : > { %1616 = vst.msk [vmem:[#allocation2 + $0x78] sm:$0xff] %vm588_vm1, %v1599_v39  ;;  %3209 = vmatprep.mubr.msk.f32.mxu1 %vm588_vm1, %v1680_v40  ;;  %v1681_v60 = vmul.f32 %v3697_v36, %v1665_v41  ;;  %3378 = vmatpush3.bf16.msra.mxu1 %v3375_v37 }
 0x27d   : > { %3380 = vmatprep.subr.bf16.mxu1 %v3379_v6 }
 0x27e   : > { %3210 = vmatmul.mubr.msk.f32.gmra.mrb[44].mxu1 %vm588_vm1, %v1681_v60 }
 0x280   : > { %3382 = vmatpush3.bf16.msra.mxu1 %v3379_v6 }
 0x281   : > { %v1666_v44 = vld [vmem:[#allocation2 + $0x70] sm:$0xff]  ;;  %3384 = vmatprep.subr.bf16.mxu1 %v3383_v9 }
 0x282   : > { %v1682_v46 = vmul.f32 %v3699_v43, %v1666_v44 }
 0x283   : > { %v1667_v13 = vld [vmem:[#allocation2 + $0x78] sm:$0xff] }
 0x284   : > { %3212 = vmatprep.mubr.msk.f32.mxu1 %vm588_vm1, %v1682_v46  ;;  %v1683_v1 = vmul.f32 %v3701_v15, %v1667_v13  ;;  %3386 = vmatpush3.bf16.msra.mxu1 %v3383_v9 }
 0x285   : > { %3388 = vmatprep.subr.bf16.mxu1 %v3387_v58 }
 0x286   : > { %3213 = vmatmul.mubr.msk.f32.gmra.mrb[46].mxu1 %vm588_vm1, %v1683_v1 }
 0x288   : > { %3390 = vmatpush3.bf16.msra.mxu1 %v3387_v58 }
 0x321   : > { %v3193_v31 = vpop.f32.mrb[32].mxu1 }
 0x322   : > { %v2103_v10 = vadd.f32 %v3193_v31, %v2864_v42  ;;  %v2016_v11 = vpop.f32.mrb[33].mxu1 }
 0x323   : > { %v2102_v12 = vadd.f32 %v2864_v42, %v2016_v11 }
 0x324   : > { %v2119_v17 = vmax.f32 %v2103_v10, 0.0 }
 0x325   : > { %v2118_v14 = vmax.f32 %v2102_v12, 0.0 }
 0x327   : > { %3247 = vmatprep.mubr.f32.mxu0 %v2118_v14 }
 0x328   : > { %3248 = vmatmul.mubr.f32.vlgmr.msra.gmra.mrb[64].mxu0 %v2119_v17 }
 0x329   : > { %v3196_v18 = vpop.f32.mrb[34].mxu1 }
 0x32a   : > { %v2105_v19 = vadd.f32 %v3196_v18, %v2864_v42  ;;  %v2026_v20 = vpop.f32.mrb[35].mxu1 }
 0x32b   : > { %v2104_v21 = vadd.f32 %v2864_v42, %v2026_v20 }
 0x32c   : > { %v2121_v24 = vmax.f32 %v2105_v19, 0.0 }
 0x32d   : > { %v2120_v23 = vmax.f32 %v2104_v21, 0.0 }
 0x32f   : > { %3250 = vmatprep.mubr.f32.mxu0 %v2120_v23 }
 0x330   : > { %3251 = vmatmul.mubr.f32.gmra.mrb[66].mxu0 %v2121_v24 }
 0x331   : > { %v3199_v25 = vpop.f32.mrb[36].mxu1 }
 0x332   : > { %v2107_v26 = vadd.f32 %v3199_v25, %v2864_v42  ;;  %v2036_v45 = vpop.f32.mrb[37].mxu1 }
 0x333   : > { %v2106_v57 = vadd.f32 %v2864_v42, %v2036_v45 }
 0x334   : > { %v2123_v27 = vmax.f32 %v2107_v26, 0.0 }
 0x335   : > { %v2122_v62 = vmax.f32 %v2106_v57, 0.0 }
 0x337   : > { %3253 = vmatprep.mubr.f32.mxu0 %v2122_v62 }
 0x338   : > { %3254 = vmatmul.mubr.f32.gmra.mrb[68].mxu0 %v2123_v27 }
 0x339   : > { %v3202_v28 = vpop.f32.mrb[38].mxu1 }
 0x33a   : > { %v2109_v30 = vadd.f32 %v3202_v28, %v2864_v42  ;;  %v2046_v47 = vpop.f32.mrb[39].mxu1 }
 0x33b   : > { %v2108_v0 = vadd.f32 %v2864_v42, %v2046_v47 }
 0x33c   : > { %v2125_v32 = vmax.f32 %v2109_v30, 0.0 }
 0x33d   : > { %v2124_v63 = vmax.f32 %v2108_v0, 0.0 }
 0x33f   : > { %3256 = vmatprep.mubr.f32.mxu0 %v2124_v63 }
 0x340   : > { %3257 = vmatmul.mubr.f32.gmra.mrb[70].mxu0 %v2125_v32 }
 0x341   : > { %v3205_v33 = vpop.f32.mrb[40].mxu1 }
 0x342   : > { %v2111_v34 = vadd.f32 %v3205_v33, %v2864_v42  ;;  %v2056_v35 = vpop.f32.mrb[41].mxu1 }
 0x343   : > { %v2110_v36 = vadd.f32 %v2864_v42, %v2056_v35 }
 0x344   : > { %v2127_v39 = vmax.f32 %v2111_v34, 0.0 }
 0x345   : > { %v2126_v38 = vmax.f32 %v2110_v36, 0.0 }
 0x347   : > { %3259 = vmatprep.mubr.f32.mxu0 %v2126_v38 }
 0x348   : > { %3260 = vmatmul.mubr.f32.gmra.mrb[72].mxu0 %v2127_v39 }
 0x349   : > { %v3208_v40 = vpop.f32.mrb[42].mxu1 }
 0x34a   : > { %v2113_v41 = vadd.f32 %v3208_v40, %v2864_v42  ;;  %v2066_v60 = vpop.f32.mrb[43].mxu1 }
 0x34b   : > { %v2112_v43 = vadd.f32 %v2864_v42, %v2066_v60 }
 0x34c   : > { %v2129_v44 = vmax.f32 %v2113_v41, 0.0 }
 0x34d   : > { %v2128_v15 = vmax.f32 %v2112_v43, 0.0 }
 0x34f   : > { %3262 = vmatprep.mubr.f32.mxu0 %v2128_v15 }
 0x350   : > { %3263 = vmatmul.mubr.f32.gmra.mrb[74].mxu0 %v2129_v44 }
 0x351   : > { %v3211_v46 = vpop.f32.mrb[44].mxu1 }
 0x352   : > { %v2115_v13 = vadd.f32 %v3211_v46, %v2864_v42  ;;  %v2076_v1 = vpop.f32.mrb[45].mxu1  ;;  %v2866_v46 = vld [vmem:[#allocation15] ss:$0 sm:$0xff] }
 0x353   : > { %v2114_v48 = vadd.f32 %v2864_v42, %v2076_v1 }
 0x354   : > { %v2131_v22 = vmax.f32 %v2115_v13, 0.0 }
 0x355   : > { %v2130_v49 = vmax.f32 %v2114_v48, 0.0 }
 0x357   : > { %3265 = vmatprep.mubr.f32.mxu0 %v2130_v49 }
 0x358   : > { %3266 = vmatmul.mubr.f32.gmra.mrb[76].mxu0 %v2131_v22 }
 0x359   : > { %v3214_v50 = vpop.f32.mrb[46].mxu1 }
 0x35a   : > { %v2117_v51 = vadd.f32 %v3214_v50, %v2864_v42  ;;  %v2086_v16 = vpop.f32.mrb[47].mxu1 }
 0x35b   : > { %v2116_v52 = vadd.f32 %v2864_v42, %v2086_v16 }
 0x35c   : > { %v2133_v54 = vmax.f32 %v2117_v51, 0.0 }
 0x35d   : > { %v2132_v53 = vmax.f32 %v2116_v52, 0.0 }
 0x35f   : > { %3268 = vmatprep.mubr.f32.mxu0 %v2132_v53 }
 0x360   : > { %3269 = vmatmul.mubr.f32.gmra.mrb[78].mxu0 %v2133_v54 }
 0x3fb   : > { %v3249_v61 = vpop.f32.mrb[64].mxu0 }
 0x3fc   : > { %v2229_v2 = vadd.f32 %v3249_v61, %v2865_v59  ;;  %v2223_v3 = vpop.f32.mrb[65].mxu0 }
 0x3fd   : > { %v2224_v4 = vadd.f32 %v2865_v59, %v2223_v3 }
 0x3fe   : > { %v2303_v5 = vmax.f32 %v2229_v2, 0.0 }
 0x3ff   : > { %v2302_v37 = vmax.f32 %v2224_v4, 0.0 }
 0x401   : > { %3303 = vmatprep.mubr.f32.mxu1 %v2302_v37 }
 0x402   : > { %3304 = vmatmul.mubr.f32.vlgmr.msra.gmra.mrb[48].mxu1 %v2303_v5 }
 0x403   : > { %v3252_v29 = vpop.f32.mrb[66].mxu0 }
 0x404   : > { %v2239_v6 = vadd.f32 %v3252_v29, %v2865_v59  ;;  %v2233_v7 = vpop.f32.mrb[67].mxu0 }
 0x405   : > { %v2234_v8 = vadd.f32 %v2865_v59, %v2233_v7 }
 0x406   : > { %v2305_v42 = vmax.f32 %v2239_v6, 0.0 }
 0x407   : > { %v2304_v9 = vmax.f32 %v2234_v8, 0.0 }
 0x409   : > { %3306 = vmatprep.mubr.f32.mxu1 %v2304_v9 }
 0x40a   : > { %3307 = vmatmul.mubr.f32.gmra.mrb[50].mxu1 %v2305_v42 }
 0x40b   : > { %v3255_v31 = vpop.f32.mrb[68].mxu0 }
 0x40c   : > { %v2249_v10 = vadd.f32 %v3255_v31, %v2865_v59  ;;  %v2243_v11 = vpop.f32.mrb[69].mxu0 }
 0x40d   : > { %v2244_v12 = vadd.f32 %v2865_v59, %v2243_v11 }
 0x40e   : > { %v2307_v17 = vmax.f32 %v2249_v10, 0.0 }
 0x40f   : > { %v2306_v14 = vmax.f32 %v2244_v12, 0.0 }
 0x411   : > { %3309 = vmatprep.mubr.f32.mxu1 %v2306_v14 }
 0x412   : > { %3310 = vmatmul.mubr.f32.gmra.mrb[52].mxu1 %v2307_v17 }
 0x413   : > { %v3258_v18 = vpop.f32.mrb[70].mxu0 }
 0x414   : > { %v2259_v19 = vadd.f32 %v3258_v18, %v2865_v59  ;;  %v2253_v20 = vpop.f32.mrb[71].mxu0 }
 0x415   : > { %v2254_v21 = vadd.f32 %v2865_v59, %v2253_v20 }
 0x416   : > { %v2309_v24 = vmax.f32 %v2259_v19, 0.0 }
 0x417   : > { %v2308_v23 = vmax.f32 %v2254_v21, 0.0 }
 0x419   : > { %3312 = vmatprep.mubr.f32.mxu1 %v2308_v23 }
 0x41a   : > { %3313 = vmatmul.mubr.f32.gmra.mrb[54].mxu1 %v2309_v24 }
 0x41b   : > { %v3261_v25 = vpop.f32.mrb[72].mxu0 }
 0x41c   : > { %v2269_v26 = vadd.f32 %v3261_v25, %v2865_v59  ;;  %v2263_v45 = vpop.f32.mrb[73].mxu0 }
 0x41d   : > { %v2264_v57 = vadd.f32 %v2865_v59, %v2263_v45 }
 0x41e   : > { %v2311_v27 = vmax.f32 %v2269_v26, 0.0 }
 0x41f   : > { %v2310_v62 = vmax.f32 %v2264_v57, 0.0 }
 0x421   : > { %3315 = vmatprep.mubr.f32.mxu1 %v2310_v62 }
 0x422   : > { %3316 = vmatmul.mubr.f32.gmra.mrb[56].mxu1 %v2311_v27 }
 0x423   : > { %v3264_v28 = vpop.f32.mrb[74].mxu0 }
 0x424   : > { %v2279_v30 = vadd.f32 %v3264_v28, %v2865_v59  ;;  %v2273_v47 = vpop.f32.mrb[75].mxu0 }
 0x425   : > { %v2274_v0 = vadd.f32 %v2865_v59, %v2273_v47 }
 0x426   : > { %v2313_v32 = vmax.f32 %v2279_v30, 0.0 }
 0x427   : > { %v2312_v63 = vmax.f32 %v2274_v0, 0.0 }
 0x429   : > { %3318 = vmatprep.mubr.f32.mxu1 %v2312_v63 }
 0x42a   : > { %3319 = vmatmul.mubr.f32.gmra.mrb[58].mxu1 %v2313_v32 }
 0x42b   : > { %v3267_v33 = vpop.f32.mrb[76].mxu0 }
 0x42c   : > { %v2289_v34 = vadd.f32 %v3267_v33, %v2865_v59  ;;  %v2283_v35 = vpop.f32.mrb[77].mxu0 }
 0x42d   : > { %v2284_v36 = vadd.f32 %v2865_v59, %v2283_v35 }
 0x42e   : > { %v2315_v39 = vmax.f32 %v2289_v34, 0.0 }
 0x42f   : > { %v2314_v38 = vmax.f32 %v2284_v36, 0.0 }
 0x431   : > { %3321 = vmatprep.mubr.f32.mxu1 %v2314_v38 }
 0x432   : > { %3322 = vmatmul.mubr.f32.gmra.mrb[60].mxu1 %v2315_v39 }
 0x433   : > { %v3270_v40 = vpop.f32.mrb[78].mxu0 }
 0x434   : > { %v2299_v41 = vadd.f32 %v3270_v40, %v2865_v59  ;;  %v2293_v60 = vpop.f32.mrb[79].mxu0 }
 0x435   : > { %v2294_v43 = vadd.f32 %v2865_v59, %v2293_v60 }
 0x436   : > { %v2317_v44 = vmax.f32 %v2299_v41, 0.0 }
 0x437   : > { %v2316_v15 = vmax.f32 %v2294_v43, 0.0 }
 0x439   : > { %3324 = vmatprep.mubr.f32.mxu1 %v2316_v15 }
 0x43a   : > { %3325 = vmatmul.mubr.f32.gmra.mrb[62].mxu1 %v2317_v44 }
 0x4d5   : > { %v3305_v13 = vpop.f32.mrb[48].mxu1 }
 0x4d6   : > { %v2413_v1 = vadd.f32 %v3305_v13, %v2866_v46  ;;  %v2407_v48 = vpop.f32.mrb[49].mxu1 }
 0x4d7   : > { %v2408_v49 = vadd.f32 %v2866_v46, %v2407_v48 }
 0x4d8   : > { %2487 = vst [vmem:[%s4770_s24 + $0x8] sm:$0xff] %v2413_v1 }
 0x4d9   : > { %2486 = vst [vmem:[%s4770_s24] sm:$0xff] %v2408_v49 }
 0x4dd   : > { %v3308_v22 = vpop.f32.mrb[50].mxu1 }
 0x4de   : > { %v2423_v50 = vadd.f32 %v3308_v22, %v2866_v46  ;;  %v2417_v51 = vpop.f32.mrb[51].mxu1 }
 0x4df   : > { %v2418_v16 = vadd.f32 %v2866_v46, %v2417_v51 }
 0x4e0   : > { %2489 = vst [vmem:[%s4770_s24 + $0x18] sm:$0xff] %v2423_v50 }
 0x4e1   : > { %2488 = vst [vmem:[%s4770_s24 + $0x10] sm:$0xff] %v2418_v16 }
 0x4e5   : > { %v3311_v52 = vpop.f32.mrb[52].mxu1 }
 0x4e6   : > { %v2433_v53 = vadd.f32 %v3311_v52, %v2866_v46  ;;  %v2427_v54 = vpop.f32.mrb[53].mxu1 }
 0x4e7   : > { %v2428_v55 = vadd.f32 %v2866_v46, %v2427_v54 }
 0x4e8   : > { %2491 = vst [vmem:[%s4770_s24 + $0x28] sm:$0xff] %v2433_v53 }
 0x4e9   : > { %2490 = vst [vmem:[%s4770_s24 + $0x20] sm:$0xff] %v2428_v55 }
 0x4ed   : > { %v3314_v56 = vpop.f32.mrb[54].mxu1 }
 0x4ee   : > { %v2443_v58 = vadd.f32 %v3314_v56, %v2866_v46  ;;  %v2437_v59 = vpop.f32.mrb[55].mxu1 }
 0x4ef   : > { %v2438_v61 = vadd.f32 %v2866_v46, %v2437_v59 }
 0x4f0   : > { %2493 = vst [vmem:[%s4770_s24 + $0x38] sm:$0xff] %v2443_v58 }
 0x4f1   : > { %2492 = vst [vmem:[%s4770_s24 + $0x30] sm:$0xff] %v2438_v61 }
 0x4f5   : > { %v3317_v2 = vpop.f32.mrb[56].mxu1 }
 0x4f6   : > { %v2453_v3 = vadd.f32 %v3317_v2, %v2866_v46  ;;  %v2447_v4 = vpop.f32.mrb[57].mxu1 }
 0x4f7   : > { %v2448_v37 = vadd.f32 %v2866_v46, %v2447_v4 }
 0x4f8   : > { %2495 = vst [vmem:[%s4770_s24 + $0x48] sm:$0xff] %v2453_v3 }
 0x4f9   : > { %2494 = vst [vmem:[%s4770_s24 + $0x40] sm:$0xff] %v2448_v37 }
 0x4fd   : > { %v3320_v5 = vpop.f32.mrb[58].mxu1 }
 0x4fe   : > { %v2463_v29 = vadd.f32 %v3320_v5, %v2866_v46  ;;  %v2457_v6 = vpop.f32.mrb[59].mxu1 }
 0x4ff   : > { %v2458_v7 = vadd.f32 %v2866_v46, %v2457_v6 }
 0x500   : > { %2497 = vst [vmem:[%s4770_s24 + $0x58] sm:$0xff] %v2463_v29 }
 0x501   : > { %2496 = vst [vmem:[%s4770_s24 + $0x50] sm:$0xff] %v2458_v7 }
 0x505   : > { %v3323_v8 = vpop.f32.mrb[60].mxu1 }
 0x506   : > { %v2473_v9 = vadd.f32 %v3323_v8, %v2866_v46  ;;  %v2467_v42 = vpop.f32.mrb[61].mxu1 }
 0x507   : > { %v2468_v31 = vadd.f32 %v2866_v46, %v2467_v42 }
 0x508   : > { %2499 = vst [vmem:[%s4770_s24 + $0x68] sm:$0xff] %v2473_v9 }
 0x509   : > { %2498 = vst [vmem:[%s4770_s24 + $0x60] sm:$0xff] %v2468_v31 }
 0x50d   : > { %v3326_v10 = vpop.f32.mrb[62].mxu1 }
 0x50e   : > { %v2483_v11 = vadd.f32 %v3326_v10, %v2866_v46  ;;  %v2477_v12 = vpop.f32.mrb[63].mxu1 }
 0x50f   : > { %v2478_v14 = vadd.f32 %v2866_v46, %v2477_v12 }
 0x510   : > { %2501 = vst [vmem:[%s4770_s24 + $0x78] sm:$0xff] %v2483_v11 }
 0x511   : > { %2500 = vst [vmem:[%s4770_s24 + $0x70] sm:$0xff] %v2478_v14 }
 0x512   : > { %3941 = shalt.err (!%p3938_p8)
}
 0x513   : > { %s3942_s28 = scalar_lea.hbm %s4791_s25, 2048  ;;  %s3946_s14 = scalar_lea.hbm %s4887_s11, 12288 }
 0x514   : > { %p3943_p1 = scmp.ne.s32.totalorder %s4791_s25, %s3942_s28  ;;  %p3947_p6 = scmp.lt.u32.totalorder %s4791_s25, %s4887_s11 }
 0x515   : > { %p3948_p13 = scmp.lt.u32.totalorder %s3946_s14, %s3942_s28  ;;  %p3950_p2 = scmp.lt.u32.totalorder %s3942_s28, %s4791_s25 }
 0x516   : > { %p3944_p3 = pnand %p3943_p1, %p4888_p4 }
 0x517   : > { %p3949_p5 = por %p3948_p13, %p3947_p6 }
 0x518   : > { %p3945_p10 = pneg %p3944_p3 }
 0x519   : > { %p3951_p9 = por %p3950_p2, %p3949_p5 }
 0x51b   : > { %p3952_p11 = pnand %p3951_p9, %p3945_p10 }
 0x51d   : > { %3955 = shalt.err (!%p3952_p11)
}
 0x51e   : > { %s4042_s26 = smov 128   ;;  %s4043_s3 = smov 8  }
 0x51f   : > { %3440 = dma.vmem_to_hbm [thread:$0]  (%p4888_p4), %s4793_s12, 2048, %s4791_s25, %s2503_s27, %s4042_s26, %s4042_s26, %s4043_s3  }
 0x520 PF: > { %p3487_p12 = scmp.ge.s32.totalorder %s4026_s22, 2  ;;  %s2531_s2 = sand.u32 1, %s4006_s17  }
 0x521   : > { %p4889_p0 = scmp.ne.s32.totalorder %s4881_s16, 0  ;;  %s2532_s20 = scalar_lea.sflag [#allocation5], %s2531_s2 }
 0x523   : > { %p3469_p7 = pnand %p3487_p12, %p4889_p0 }
 0x525   : > { %4001 = dma.done.wait (!%p3469_p7), %s2532_s20, 2048  }
 0x526   : > { %4003 = vsyncadd (!%p3469_p7), %s2532_s20, 4294965248  ;;  %s31_s22 = sadd.s32 1, %s4026_s22   ;;  %s4890_s17 = smov %s4010_s18 }
 0x527   : > { %p28_p8 = scmp.ge.s32.totalorder %s31_s22, 8   ;;  %s4891_s18 = smov %s4014_s19 }
 0x528   : > { %s4892_s19 = smov %s4333_s8  ;;  %s4893_s20 = smov %s4022_s21 }
 0x529   : > { %s4894_s21 = smov %s4896_s13  ;;  %30 = sbr.rel (!%p28_p8) target bundleno = 18 (0x12), region = 154 }
 0x530   :  { %2537 = vsyncpa [#allocation4], 1 }
 0x531   :  { %2539 = vsyncpa [#allocation4 + $0x1], 1 }
 0x532   :  { %2540 = vsyncpa [#allocation7], 1 }
 0x533   :  { %2541 = vsyncpa [#allocation10], 1 }
 0x534   :  { %2542 = vsyncpa [#allocation13], 1 }
 0x535   :  { %2543 = vsyncpa [#allocation16], 1 }
 0x536   :  { %2544 = vsyncpa [#allocation5], 1 }
 0x537   :  { %2546 = vsyncpa [#allocation5 + $0x1], 1 }

</bundles_post_ra>
